<compile_context>
chip_gen: v7x
topology: tpu7x:2x2x1
jax: 0.10.0
libtpu: 0.0.40
codegen_flags: <defaults>
</compile_context>

<pallas_src>
import functools

import jax
import jax.numpy as jnp
from jax import lax
from jax.experimental import pallas as pl
from jax.experimental.pallas import tpu as pltpu

_VMEM_LIMIT = 32 * 1024 * 1024      # valid on v5e/v6e (128 MiB) and v7x (64 MiB)


# ------------------------------- kernels ------------------------------------

def _frontend_kernel(ff_ref, fb_ref, wc_ref, gamma_ref, beta_ref, wu_ref,
                     slab_ref, xc_ref):
    """conv-as-matmul + LayerNorm + batched U projection (both directions)."""

    def conv_ln(frames):
        x = jnp.dot(frames.astype(jnp.bfloat16), wc_ref[...],
                    preferred_element_type=jnp.float32)            # (R, C)
        mu = jnp.mean(x, axis=-1, keepdims=True)
        var = jnp.mean(jnp.square(x - mu), axis=-1, keepdims=True)
        xn = (x - mu) * lax.rsqrt(var + 1e-5)
        return x, xn * gamma_ref[...] + beta_ref[...]

    xc_f, xn_f = conv_ln(ff_ref[...])          # forward-time stream
    _, xn_b = conv_ln(fb_ref[...])             # fully time-reversed stream

    # One MXU matmul (contraction depth 2C) produces the interleaved slab
    # [u0f|u0b|u1f|u1b|u2f|u2b|u3f|u3b] via the block-structured weight.
    xn2 = jnp.concatenate([xn_f, xn_b], axis=-1).astype(jnp.bfloat16)
    u = jnp.dot(xn2, wu_ref[...], preferred_element_type=jnp.float32)

    slab_ref[...] = u.astype(slab_ref.dtype)   # lane-dense 256-wide bf16 store
    xc_ref[...] = xc_f                         # raw conv out for gating


def _sru_kernel(slab_ref, v_ref, b_ref, hf_ref, hb_ref, c_ref,
                *, tt, bp, c, pad):
    """Fused fwd+bwd SRU recurrence, TT timesteps per grid step (VPU/EUP only).

    slab_ref: (TT, Bp, 8C) bf16; hf/hb: (TT, Bp, C) bf16; c_ref: (Bp, 2C) f32.
    Columns of every per-step (Bp, 8C) row group:
        [u0 | u1 | u2 | u3] each 2C wide, halves = [fwd | bwd]."""
    i = pl.program_id(0)

    @pl.when(i == 0)
    def _():
        c_ref[...] = jnp.zeros_like(c_ref)

    c2 = 2 * c
    # hoisted out of the unrolled loop (JAX does not CSE broadcast_in_dim)
    vf = jnp.broadcast_to(v_ref[0:1, :], (bp, c2))
    vr = jnp.broadcast_to(v_ref[1:2, :], (bp, c2))
    bf = jnp.broadcast_to(b_ref[0:1, :], (bp, c2))
    br = jnp.broadcast_to(b_ref[1:2, :], (bp, c2))
    if pad:
        # the backward stream starts with `pad` zero timesteps: keep its cell
        # state clamped to 0 until its first real timestep.
        lane = lax.broadcasted_iota(jnp.int32, (bp, c2), 1)
        fwd_lane = (lane < c).astype(jnp.float32)

    def step(s, cs):
        blk = slab_ref[s].astype(jnp.float32)                      # (Bp, 8C)
        u0 = blk[:, 0 * c2:1 * c2]
        u1 = blk[:, 1 * c2:2 * c2]
        u2 = blk[:, 2 * c2:3 * c2]
        u3 = blk[:, 3 * c2:4 * c2]

        f = jax.nn.sigmoid(u1 + vf * cs + bf)
        r = jax.nn.sigmoid(u2 + vr * cs + br)
        cs = f * cs + (1.0 - f) * u0
        h = r * cs + (1.0 - r) * u3                                # (Bp, 2C)

        hf_ref[s] = h[:, :c].astype(hf_ref.dtype)
        # bwd h of step s belongs to the mirrored time index; together with
        # the rev_block out index map this lands it in forward time order.
        hb_ref[tt - 1 - s] = h[:, c:].astype(hb_ref.dtype)

        if pad:
            keep = (i * tt + s >= pad).astype(jnp.float32)
            cs = cs * (fwd_lane + (1.0 - fwd_lane) * keep)
        return cs

    cs = lax.fori_loop(0, tt, step, c_ref[...], unroll=min(tt, 8))
    c_ref[...] = cs


def _backend_kernel(hf_ref, hb_ref, xc_ref, wo_ref, wd_ref, o_ref):
    """outfc (single matmul on pre-concatenated weight) + gating + deconv + tanh."""
    h = jnp.concatenate([hf_ref[...], hb_ref[...]], axis=-1)       # (R, 2C) bf16
    y = jnp.dot(h, wo_ref[...], preferred_element_type=jnp.float32)
    g = xc_ref[...] * y                                            # gating
    frames = jnp.dot(g.astype(jnp.bfloat16), wd_ref[...],
                     preferred_element_type=jnp.float32)
    o_ref[...] = jnp.tanh(frames).astype(o_ref.dtype)


# ----------------------------- host wrapper ----------------------------------

def _round_up(x, m):
    return ((x + m - 1) // m) * m


def _pick_time_block(t, lo=32, hi=64):
    """SRU timesteps per serial grid step: prefer a divisor of t in [lo, hi],
    otherwise pad t up to a multiple of `lo` (avoids the TT=1 cliff)."""
    for tt in range(min(hi, t), 0, -1):
        if t % tt == 0 and tt >= min(lo, t):
            return tt, t
    return lo, _round_up(t, lo)


def _largest_divisor_leq(n, m):
    for k in range(max(1, min(n, m)), 0, -1):
        if n % k == 0:
            return k
    return 1


def conv_bsru_forward(x, params, frame_size, conv_channels):
    """x: (B, 1, L) float32 -> (B, 1, L) float32 (stride == frame_size path)."""
    B, _, L = x.shape
    K, C = frame_size, conv_channels
    if L % K != 0:
        raise ValueError("length must be a multiple of frame_size")
    T = L // K
    Bp = _round_up(B, 8)                     # sublane-aligned rows per timestep
    TT, Tp = _pick_time_block(T)             # serial block size, padded T
    pad_t = Tp - T
    nb = Tp // TT
    rows = Tp * Bp

    # frontend / backend are time-parallel: use big row blocks (~2048 rows),
    # a multiple of TT so every block boundary divides exactly.
    kdiv = _largest_divisor_leq(nb, max(1, 2048 // (TT * Bp)))
    TB = TT * kdiv
    nbig = Tp // TB
    RB = TB * Bp

    # host-side framing (smallest tensors only): batch pad, time-major, time
    # pad, plus a fully time-reversed copy so the SRU's backward direction
    # reads the same row index as the forward one every step.
    frames = x.reshape(B, T, K)
    if Bp != B:
        frames = jnp.pad(frames, ((0, Bp - B), (0, 0), (0, 0)))
    frames = frames.transpose(1, 0, 2)                             # (T, Bp, K)
    if pad_t:
        frames = jnp.pad(frames, ((0, pad_t), (0, 0), (0, 0)))
    frames_fwd = frames.reshape(rows, K)
    frames_bwd = frames[::-1].reshape(rows, K)

    blk = lambda i: (i, 0)
    full = lambda i: (0, 0)
    cparams = lambda sem: pltpu.CompilerParams(
        dimension_semantics=sem, vmem_limit_bytes=_VMEM_LIMIT)

    # ---- 1. frontend: conv + LayerNorm + batched U projection ----
    slab, xc = pl.pallas_call(
        _frontend_kernel,
        out_shape=[jax.ShapeDtypeStruct((rows, 8 * C), jnp.bfloat16),
                   jax.ShapeDtypeStruct((rows, C), jnp.float32)],
        grid=(nbig,),
        in_specs=[pl.BlockSpec((RB, K), blk),          # frames, forward order
                  pl.BlockSpec((RB, K), blk),          # frames, time-reversed
                  pl.BlockSpec((K, C), full),          # conv weight
                  pl.BlockSpec((1, C), full),          # LN gamma
                  pl.BlockSpec((1, C), full),          # LN beta
                  pl.BlockSpec((2 * C, 8 * C), full)], # block U weight (k=4 x 2 dir)
        out_specs=[pl.BlockSpec((RB, 8 * C), blk),     # lane-dense U slab
                   pl.BlockSpec((RB, C), blk)],        # raw conv output
        compiler_params=cparams(("parallel",)),
    )(frames_fwd, frames_bwd, params["wc"], params["gamma"], params["beta"],
      params["wu"])

    # ---- 2. SRU elementwise recurrence (fwd + bwd fused) ----
    blk3 = lambda i: (i, 0, 0)
    rev3 = lambda i: (nb - 1 - i, 0, 0)
    hf, hb = pl.pallas_call(
        functools.partial(_sru_kernel, tt=TT, bp=Bp, c=C, pad=pad_t),
        out_shape=[jax.ShapeDtypeStruct((Tp, Bp, C), jnp.bfloat16)] * 2,
        grid=(nb,),
        in_specs=[pl.BlockSpec((TT, Bp, 8 * C), blk3),  # U slab (3-D view)
                  pl.BlockSpec((2, 2 * C), full),       # v  (rows: f, r; cols fwd|bwd)
                  pl.BlockSpec((2, 2 * C), full)],      # bias
        out_specs=[pl.BlockSpec((TT, Bp, C), blk3),     # h forward
                   pl.BlockSpec((TT, Bp, C), rev3)],    # h backward (forward order)
        scratch_shapes=[pltpu.VMEM((Bp, 2 * C), jnp.float32)],   # [cf | cb]
        compiler_params=cparams(("arbitrary",)),                 # recurrence
    )(slab.reshape(Tp, Bp, 8 * C), params["v"], params["b"])

    # ---- 3. backend: outfc + gating + deconv + tanh ----
    out_frames = pl.pallas_call(
        _backend_kernel,
        out_shape=jax.ShapeDtypeStruct((rows, K), jnp.float32),
        grid=(nbig,),
        in_specs=[pl.BlockSpec((RB, C), blk),           # hf
                  pl.BlockSpec((RB, C), blk),           # hb
                  pl.BlockSpec((RB, C), blk),           # raw conv output
                  pl.BlockSpec((2 * C, C), full),       # outfc weight [Wof; Wob]
                  pl.BlockSpec((C, K), full)],          # deconv weight
        out_specs=pl.BlockSpec((RB, K), blk),
        compiler_params=cparams(("parallel",)),
    )(hf.reshape(rows, C), hb.reshape(rows, C), xc,
      params["wo"], params["wd"])

    # de-framing: drop time / batch padding, back to (B, 1, L).
    out = out_frames.reshape(Tp, Bp, K)[:T, :B].transpose(1, 0, 2)
    return out.reshape(B, 1, L)


def init_params(key, frame_size, conv_channels):
    K, C = frame_size, conv_channels
    ks = jax.random.split(key, 12)
    s = 0.1
    bh = jnp.bfloat16

    # SRU input projection: k = 4 matrices per direction (candidate, forget,
    # reset, highway), assembled into one block matrix so a single MXU matmul
    # on [xn_fwd | xn_bwd] emits the interleaved [u0f|u0b|...|u3f|u3b] slab.
    wf = [jax.random.normal(ks[1 + m], (C, C), jnp.float32) * s for m in range(4)]
    wb = [jax.random.normal(ks[5 + m], (C, C), jnp.float32) * s for m in range(4)]
    z = jnp.zeros((C, C), jnp.float32)
    cols = []
    for m in range(4):
        cols.append(jnp.concatenate([wf[m], z], axis=0))    # fwd column group
        cols.append(jnp.concatenate([z, wb[m]], axis=0))    # bwd column group
    wu = jnp.concatenate(cols, axis=1).astype(bh)           # (2C, 8C)

    return dict(
        # matmul weights in bf16 (f32 accumulation inside the kernels)
        wc=(jax.random.normal(ks[0], (K, C), jnp.float32) * s).astype(bh),
        wu=wu,
        # outfc weight pre-concatenated: y = [hf|hb] @ wo   (Linear, bias=False)
        wo=(jax.random.normal(ks[9], (2 * C, C), jnp.float32) * s).astype(bh),
        wd=(jax.random.normal(ks[10], (C, K), jnp.float32) * s).astype(bh),
        # recurrence params stay f32 (v5e VPU/EUP have no bf16);
        # row 0 = forget gate (v_f, b_f), row 1 = reset gate; cols = [fwd|bwd].
        v=jax.random.normal(ks[11], (2, 2 * C), jnp.float32) * s,
        b=jnp.zeros((2, 2 * C), jnp.float32),
        gamma=jnp.ones((1, C), jnp.float32),
        beta=jnp.zeros((1, C), jnp.float32),
    )


if __name__ == "__main__":
    key = jax.random.PRNGKey(0)
    k_x, k_p = jax.random.split(key)

    BATCH = 2
    FRAME_SIZE = 16       # conv kernel == stride -> padding 0
    CONV_CHANNELS = 32
    LENGTH = 128          # T = LENGTH // FRAME_SIZE = 8 time steps

    params = init_params(k_p, FRAME_SIZE, CONV_CHANNELS)
    x = jax.random.normal(k_x, (BATCH, 1, LENGTH), jnp.float32)

    fwd = jax.jit(functools.partial(conv_bsru_forward,
                                    frame_size=FRAME_SIZE,
                                    conv_channels=CONV_CHANNELS))
    out = jax.block_until_ready(fwd(x, params))

    assert out.shape == (BATCH, 1, LENGTH), out.shape
    assert bool(jnp.all(jnp.isfinite(out)))
    # TODO(synk): dropout / rnn_dropout omitted (training-only; eval == identity)
    print("KERNEL_OK")
</pallas_src>

<mosaic_0001>
module attributes {stable_mosaic.version = 11 : i64} {
  func.func @_sru_kernel(%arg0: i32, %arg1: memref<8x8x256xbf16, #tpu.memory_space<vmem>>, %arg2: memref<2x64xf32, #tpu.memory_space<vmem>>, %arg3: memref<2x64xf32, #tpu.memory_space<vmem>>, %arg4: memref<8x8x32xbf16, #tpu.memory_space<vmem>>, %arg5: memref<8x8x32xbf16, #tpu.memory_space<vmem>>, %arg6: memref<8x64xf32, #tpu.memory_space<vmem>>) attributes {dimension_semantics = [#tpu.dimension_semantics<arbitrary>], iteration_bounds = array<i64: 1>, scalar_prefetch = 0 : i64, scratch_operands = 1 : i64, tpu.core_type = #tpu.core_type<tc>, window_params = [{transform_indices = @transform_0, window_bounds = array<i64: 8, 8, 256>}, {pipeline_mode = #tpu.pipeline_mode<synchronous>, transform_indices = @transform_1, window_bounds = array<i64: 2, 64>}, {pipeline_mode = #tpu.pipeline_mode<synchronous>, transform_indices = @transform_2, window_bounds = array<i64: 2, 64>}, {transform_indices = @transform_3, window_bounds = array<i64: 8, 8, 32>}, {transform_indices = @transform_4, window_bounds = array<i64: 8, 8, 32>}]} {
    %c0_i32 = arith.constant 0 : i32
    %0 = arith.cmpi eq, %arg0, %c0_i32 : i32
    %1 = arith.extui %0 : i1 to i32
    %c0_i32_0 = arith.constant 0 : i32
    %2 = arith.cmpi ne, %1, %c0_i32_0 : i32
    scf.if %2 {
      %cst_99 = arith.constant 0.000000e+00 : f32
      %393 = vector.broadcast %cst_99 : f32 to vector<8x64xf32>
      %c0_100 = arith.constant 0 : index
      %c0_101 = arith.constant 0 : index
      %394 = vector.load %arg6[%c0_100, %c0_101] : memref<8x64xf32, #tpu.memory_space<vmem>>, vector<8x64xf32>
      tpu.vector_store %arg6[%c0_100, %c0_101], %393 {strides = array<i32>} : memref<8x64xf32, #tpu.memory_space<vmem>>, vector<8x64xf32>,
    } else {
    }
    %c0 = arith.constant 0 : index
    %c0_1 = arith.constant 0 : index
    %3 = vector.load %arg2[%c0, %c0_1] : memref<2x64xf32, #tpu.memory_space<vmem>>, vector<1x64xf32>
    %4 = vector.shape_cast %3 : vector<1x64xf32> to vector<1x64xf32>
    %5 = vector.broadcast %4 : vector<1x64xf32> to vector<8x64xf32>
    %c1 = arith.constant 1 : index
    %c0_2 = arith.constant 0 : index
    %6 = vector.load %arg2[%c1, %c0_2] : memref<2x64xf32, #tpu.memory_space<vmem>>, vector<1x64xf32>
    %7 = vector.shape_cast %6 : vector<1x64xf32> to vector<1x64xf32>
    %8 = vector.broadcast %7 : vector<1x64xf32> to vector<8x64xf32>
    %c0_3 = arith.constant 0 : index
    %c0_4 = arith.constant 0 : index
    %9 = vector.load %arg3[%c0_3, %c0_4] : memref<2x64xf32, #tpu.memory_space<vmem>>, vector<1x64xf32>
    %10 = vector.shape_cast %9 : vector<1x64xf32> to vector<1x64xf32>
    %11 = vector.broadcast %10 : vector<1x64xf32> to vector<8x64xf32>
    %c1_5 = arith.constant 1 : index
    %c0_6 = arith.constant 0 : index
    %12 = vector.load %arg3[%c1_5, %c0_6] : memref<2x64xf32, #tpu.memory_space<vmem>>, vector<1x64xf32>
    %13 = vector.shape_cast %12 : vector<1x64xf32> to vector<1x64xf32>
    %14 = vector.broadcast %13 : vector<1x64xf32> to vector<8x64xf32>
    %c0_7 = arith.constant 0 : index
    %c0_8 = arith.constant 0 : index
    %15 = vector.load %arg6[%c0_7, %c0_8] : memref<8x64xf32, #tpu.memory_space<vmem>>, vector<8x64xf32>
    %c0_i32_9 = arith.constant 0 : i32
    %16 = arith.index_cast %c0_i32_9 : i32 to index
    %c0_10 = arith.constant 0 : index
    %c0_11 = arith.constant 0 : index
    %17 = vector.load %arg1[%16, %c0_10, %c0_11] : memref<8x8x256xbf16, #tpu.memory_space<vmem>>, vector<1x8x256xbf16>
    %18 = vector.shape_cast %17 : vector<1x8x256xbf16> to vector<8x256xbf16>
    %19 = arith.extf %18 : vector<8x256xbf16> to vector<8x256xf32>
    %20 = vector.extract_strided_slice %19 {offsets = [0, 0], sizes = [8, 64], strides = [1, 1]} : vector<8x256xf32> to vector<8x64xf32>
    %21 = vector.extract_strided_slice %19 {offsets = [0, 64], sizes = [8, 64], strides = [1, 1]} : vector<8x256xf32> to vector<8x64xf32>
    %22 = vector.extract_strided_slice %19 {offsets = [0, 128], sizes = [8, 64], strides = [1, 1]} : vector<8x256xf32> to vector<8x64xf32>
    %23 = vector.extract_strided_slice %19 {offsets = [0, 192], sizes = [8, 64], strides = [1, 1]} : vector<8x256xf32> to vector<8x64xf32>
    %24 = arith.mulf %5, %15 : vector<8x64xf32>
    %25 = arith.addf %21, %24 : vector<8x64xf32>
    %26 = arith.addf %25, %11 : vector<8x64xf32>
    %27 = arith.negf %26 : vector<8x64xf32>
    %28 = math.exp %27 : vector<8x64xf32>
    %cst = arith.constant 1.000000e+00 : f32
    %29 = vector.broadcast %cst : f32 to vector<8x64xf32>
    %30 = arith.addf %29, %28 : vector<8x64xf32>
    %31 = arith.divf %29, %30 : vector<8x64xf32>
    %32 = arith.mulf %8, %15 : vector<8x64xf32>
    %33 = arith.addf %22, %32 : vector<8x64xf32>
    %34 = arith.addf %33, %14 : vector<8x64xf32>
    %35 = arith.negf %34 : vector<8x64xf32>
    %36 = math.exp %35 : vector<8x64xf32>
    %cst_12 = arith.constant 1.000000e+00 : f32
    %37 = vector.broadcast %cst_12 : f32 to vector<8x64xf32>
    %38 = arith.addf %37, %36 : vector<8x64xf32>
    %39 = arith.divf %37, %38 : vector<8x64xf32>
    %40 = arith.mulf %31, %15 : vector<8x64xf32>
    %cst_13 = arith.constant 1.000000e+00 : f32
    %41 = vector.broadcast %cst_13 : f32 to vector<8x64xf32>
    %42 = arith.subf %41, %31 : vector<8x64xf32>
    %43 = arith.mulf %42, %20 : vector<8x64xf32>
    %44 = arith.addf %40, %43 : vector<8x64xf32>
    %45 = arith.mulf %39, %44 : vector<8x64xf32>
    %cst_14 = arith.constant 1.000000e+00 : f32
    %46 = vector.broadcast %cst_14 : f32 to vector<8x64xf32>
    %47 = arith.subf %46, %39 : vector<8x64xf32>
    %48 = arith.mulf %47, %23 : vector<8x64xf32>
    %49 = arith.addf %45, %48 : vector<8x64xf32>
    %50 = vector.extract_strided_slice %49 {offsets = [0, 0], sizes = [8, 32], strides = [1, 1]} : vector<8x64xf32> to vector<8x32xf32>
    %51 = arith.truncf %50 : vector<8x32xf32> to vector<8x32xbf16>
    %52 = arith.index_cast %c0_i32_9 : i32 to index
    %c0_15 = arith.constant 0 : index
    %c0_16 = arith.constant 0 : index
    %53 = vector.load %arg4[%52, %c0_15, %c0_16] : memref<8x8x32xbf16, #tpu.memory_space<vmem>>, vector<1x8x32xbf16>
    %54 = vector.shape_cast %53 : vector<1x8x32xbf16> to vector<8x32xbf16>
    %55 = vector.shape_cast %51 : vector<8x32xbf16> to vector<1x8x32xbf16>
    tpu.vector_store %arg4[%52, %c0_15, %c0_16], %55 {strides = array<i32>} : memref<8x8x32xbf16, #tpu.memory_space<vmem>>, vector<1x8x32xbf16>,
    %56 = vector.extract_strided_slice %49 {offsets = [0, 32], sizes = [8, 32], strides = [1, 1]} : vector<8x64xf32> to vector<8x32xf32>
    %57 = arith.truncf %56 : vector<8x32xf32> to vector<8x32xbf16>
    %c7_i32 = arith.constant 7 : i32
    %58 = arith.subi %c7_i32, %c0_i32_9 : i32
    %59 = arith.index_cast %58 : i32 to index
    %c0_17 = arith.constant 0 : index
    %c0_18 = arith.constant 0 : index
    %60 = vector.load %arg5[%59, %c0_17, %c0_18] : memref<8x8x32xbf16, #tpu.memory_space<vmem>>, vector<1x8x32xbf16>
    %61 = vector.shape_cast %60 : vector<1x8x32xbf16> to vector<8x32xbf16>
    %62 = vector.shape_cast %57 : vector<8x32xbf16> to vector<1x8x32xbf16>
    tpu.vector_store %arg5[%59, %c0_17, %c0_18], %62 {strides = array<i32>} : memref<8x8x32xbf16, #tpu.memory_space<vmem>>, vector<1x8x32xbf16>,
    %c1_i32 = arith.constant 1 : i32
    %63 = arith.index_cast %c1_i32 : i32 to index
    %c0_19 = arith.constant 0 : index
    %c0_20 = arith.constant 0 : index
    %64 = vector.load %arg1[%63, %c0_19, %c0_20] : memref<8x8x256xbf16, #tpu.memory_space<vmem>>, vector<1x8x256xbf16>
    %65 = vector.shape_cast %64 : vector<1x8x256xbf16> to vector<8x256xbf16>
    %66 = arith.extf %65 : vector<8x256xbf16> to vector<8x256xf32>
    %67 = vector.extract_strided_slice %66 {offsets = [0, 0], sizes = [8, 64], strides = [1, 1]} : vector<8x256xf32> to vector<8x64xf32>
    %68 = vector.extract_strided_slice %66 {offsets = [0, 64], sizes = [8, 64], strides = [1, 1]} : vector<8x256xf32> to vector<8x64xf32>
    %69 = vector.extract_strided_slice %66 {offsets = [0, 128], sizes = [8, 64], strides = [1, 1]} : vector<8x256xf32> to vector<8x64xf32>
    %70 = vector.extract_strided_slice %66 {offsets = [0, 192], sizes = [8, 64], strides = [1, 1]} : vector<8x256xf32> to vector<8x64xf32>
    %71 = arith.mulf %5, %44 : vector<8x64xf32>
    %72 = arith.addf %68, %71 : vector<8x64xf32>
    %73 = arith.addf %72, %11 : vector<8x64xf32>
    %74 = arith.negf %73 : vector<8x64xf32>
    %75 = math.exp %74 : vector<8x64xf32>
    %cst_21 = arith.constant 1.000000e+00 : f32
    %76 = vector.broadcast %cst_21 : f32 to vector<8x64xf32>
    %77 = arith.addf %76, %75 : vector<8x64xf32>
    %78 = arith.divf %76, %77 : vector<8x64xf32>
    %79 = arith.mulf %8, %44 : vector<8x64xf32>
    %80 = arith.addf %69, %79 : vector<8x64xf32>
    %81 = arith.addf %80, %14 : vector<8x64xf32>
    %82 = arith.negf %81 : vector<8x64xf32>
    %83 = math.exp %82 : vector<8x64xf32>
    %cst_22 = arith.constant 1.000000e+00 : f32
    %84 = vector.broadcast %cst_22 : f32 to vector<8x64xf32>
    %85 = arith.addf %84, %83 : vector<8x64xf32>
    %86 = arith.divf %84, %85 : vector<8x64xf32>
    %87 = arith.mulf %78, %44 : vector<8x64xf32>
    %cst_23 = arith.constant 1.000000e+00 : f32
    %88 = vector.broadcast %cst_23 : f32 to vector<8x64xf32>
    %89 = arith.subf %88, %78 : vector<8x64xf32>
    %90 = arith.mulf %89, %67 : vector<8x64xf32>
    %91 = arith.addf %87, %90 : vector<8x64xf32>
    %92 = arith.mulf %86, %91 : vector<8x64xf32>
    %cst_24 = arith.constant 1.000000e+00 : f32
    %93 = vector.broadcast %cst_24 : f32 to vector<8x64xf32>
    %94 = arith.subf %93, %86 : vector<8x64xf32>
    %95 = arith.mulf %94, %70 : vector<8x64xf32>
    %96 = arith.addf %92, %95 : vector<8x64xf32>
    %97 = vector.extract_strided_slice %96 {offsets = [0, 0], sizes = [8, 32], strides = [1, 1]} : vector<8x64xf32> to vector<8x32xf32>
    %98 = arith.truncf %97 : vector<8x32xf32> to vector<8x32xbf16>
    %99 = arith.index_cast %c1_i32 : i32 to index
    %c0_25 = arith.constant 0 : index
    %c0_26 = arith.constant 0 : index
    %100 = vector.load %arg4[%99, %c0_25, %c0_26] : memref<8x8x32xbf16, #tpu.memory_space<vmem>>, vector<1x8x32xbf16>
    %101 = vector.shape_cast %100 : vector<1x8x32xbf16> to vector<8x32xbf16>
    %102 = vector.shape_cast %98 : vector<8x32xbf16> to vector<1x8x32xbf16>
    tpu.vector_store %arg4[%99, %c0_25, %c0_26], %102 {strides = array<i32>} : memref<8x8x32xbf16, #tpu.memory_space<vmem>>, vector<1x8x32xbf16>,
    %103 = vector.extract_strided_slice %96 {offsets = [0, 32], sizes = [8, 32], strides = [1, 1]} : vector<8x64xf32> to vector<8x32xf32>
    %104 = arith.truncf %103 : vector<8x32xf32> to vector<8x32xbf16>
    %c7_i32_27 = arith.constant 7 : i32
    %105 = arith.subi %c7_i32_27, %c1_i32 : i32
    %106 = arith.index_cast %105 : i32 to index
    %c0_28 = arith.constant 0 : index
    %c0_29 = arith.constant 0 : index
    %107 = vector.load %arg5[%106, %c0_28, %c0_29] : memref<8x8x32xbf16, #tpu.memory_space<vmem>>, vector<1x8x32xbf16>
    %108 = vector.shape_cast %107 : vector<1x8x32xbf16> to vector<8x32xbf16>
    %109 = vector.shape_cast %104 : vector<8x32xbf16> to vector<1x8x32xbf16>
    tpu.vector_store %arg5[%106, %c0_28, %c0_29], %109 {strides = array<i32>} : memref<8x8x32xbf16, #tpu.memory_space<vmem>>, vector<1x8x32xbf16>,
    %c2_i32 = arith.constant 2 : i32
    %110 = arith.index_cast %c2_i32 : i32 to index
    %c0_30 = arith.constant 0 : index
    %c0_31 = arith.constant 0 : index
    %111 = vector.load %arg1[%110, %c0_30, %c0_31] : memref<8x8x256xbf16, #tpu.memory_space<vmem>>, vector<1x8x256xbf16>
    %112 = vector.shape_cast %111 : vector<1x8x256xbf16> to vector<8x256xbf16>
    %113 = arith.extf %112 : vector<8x256xbf16> to vector<8x256xf32>
    %114 = vector.extract_strided_slice %113 {offsets = [0, 0], sizes = [8, 64], strides = [1, 1]} : vector<8x256xf32> to vector<8x64xf32>
    %115 = vector.extract_strided_slice %113 {offsets = [0, 64], sizes = [8, 64], strides = [1, 1]} : vector<8x256xf32> to vector<8x64xf32>
    %116 = vector.extract_strided_slice %113 {offsets = [0, 128], sizes = [8, 64], strides = [1, 1]} : vector<8x256xf32> to vector<8x64xf32>
    %117 = vector.extract_strided_slice %113 {offsets = [0, 192], sizes = [8, 64], strides = [1, 1]} : vector<8x256xf32> to vector<8x64xf32>
    %118 = arith.mulf %5, %91 : vector<8x64xf32>
    %119 = arith.addf %115, %118 : vector<8x64xf32>
    %120 = arith.addf %119, %11 : vector<8x64xf32>
    %121 = arith.negf %120 : vector<8x64xf32>
    %122 = math.exp %121 : vector<8x64xf32>
    %cst_32 = arith.constant 1.000000e+00 : f32
    %123 = vector.broadcast %cst_32 : f32 to vector<8x64xf32>
    %124 = arith.addf %123, %122 : vector<8x64xf32>
    %125 = arith.divf %123, %124 : vector<8x64xf32>
    %126 = arith.mulf %8, %91 : vector<8x64xf32>
    %127 = arith.addf %116, %126 : vector<8x64xf32>
    %128 = arith.addf %127, %14 : vector<8x64xf32>
    %129 = arith.negf %128 : vector<8x64xf32>
    %130 = math.exp %129 : vector<8x64xf32>
    %cst_33 = arith.constant 1.000000e+00 : f32
    %131 = vector.broadcast %cst_33 : f32 to vector<8x64xf32>
    %132 = arith.addf %131, %130 : vector<8x64xf32>
    %133 = arith.divf %131, %132 : vector<8x64xf32>
    %134 = arith.mulf %125, %91 : vector<8x64xf32>
    %cst_34 = arith.constant 1.000000e+00 : f32
    %135 = vector.broadcast %cst_34 : f32 to vector<8x64xf32>
    %136 = arith.subf %135, %125 : vector<8x64xf32>
    %137 = arith.mulf %136, %114 : vector<8x64xf32>
    %138 = arith.addf %134, %137 : vector<8x64xf32>
    %139 = arith.mulf %133, %138 : vector<8x64xf32>
    %cst_35 = arith.constant 1.000000e+00 : f32
    %140 = vector.broadcast %cst_35 : f32 to vector<8x64xf32>
    %141 = arith.subf %140, %133 : vector<8x64xf32>
    %142 = arith.mulf %141, %117 : vector<8x64xf32>
    %143 = arith.addf %139, %142 : vector<8x64xf32>
    %144 = vector.extract_strided_slice %143 {offsets = [0, 0], sizes = [8, 32], strides = [1, 1]} : vector<8x64xf32> to vector<8x32xf32>
    %145 = arith.truncf %144 : vector<8x32xf32> to vector<8x32xbf16>
    %146 = arith.index_cast %c2_i32 : i32 to index
    %c0_36 = arith.constant 0 : index
    %c0_37 = arith.constant 0 : index
    %147 = vector.load %arg4[%146, %c0_36, %c0_37] : memref<8x8x32xbf16, #tpu.memory_space<vmem>>, vector<1x8x32xbf16>
    %148 = vector.shape_cast %147 : vector<1x8x32xbf16> to vector<8x32xbf16>
    %149 = vector.shape_cast %145 : vector<8x32xbf16> to vector<1x8x32xbf16>
    tpu.vector_store %arg4[%146, %c0_36, %c0_37], %149 {strides = array<i32>} : memref<8x8x32xbf16, #tpu.memory_space<vmem>>, vector<1x8x32xbf16>,
    %150 = vector.extract_strided_slice %143 {offsets = [0, 32], sizes = [8, 32], strides = [1, 1]} : vector<8x64xf32> to vector<8x32xf32>
    %151 = arith.truncf %150 : vector<8x32xf32> to vector<8x32xbf16>
    %c7_i32_38 = arith.constant 7 : i32
    %152 = arith.subi %c7_i32_38, %c2_i32 : i32
    %153 = arith.index_cast %152 : i32 to index
    %c0_39 = arith.constant 0 : index
    %c0_40 = arith.constant 0 : index
    %154 = vector.load %arg5[%153, %c0_39, %c0_40] : memref<8x8x32xbf16, #tpu.memory_space<vmem>>, vector<1x8x32xbf16>
    %155 = vector.shape_cast %154 : vector<1x8x32xbf16> to vector<8x32xbf16>
    %156 = vector.shape_cast %151 : vector<8x32xbf16> to vector<1x8x32xbf16>
    tpu.vector_store %arg5[%153, %c0_39, %c0_40], %156 {strides = array<i32>} : memref<8x8x32xbf16, #tpu.memory_space<vmem>>, vector<1x8x32xbf16>,
    %c3_i32 = arith.constant 3 : i32
    %157 = arith.index_cast %c3_i32 : i32 to index
    %c0_41 = arith.constant 0 : index
    %c0_42 = arith.constant 0 : index
    %158 = vector.load %arg1[%157, %c0_41, %c0_42] : memref<8x8x256xbf16, #tpu.memory_space<vmem>>, vector<1x8x256xbf16>
    %159 = vector.shape_cast %158 : vector<1x8x256xbf16> to vector<8x256xbf16>
    %160 = arith.extf %159 : vector<8x256xbf16> to vector<8x256xf32>
    %161 = vector.extract_strided_slice %160 {offsets = [0, 0], sizes = [8, 64], strides = [1, 1]} : vector<8x256xf32> to vector<8x64xf32>
    %162 = vector.extract_strided_slice %160 {offsets = [0, 64], sizes = [8, 64], strides = [1, 1]} : vector<8x256xf32> to vector<8x64xf32>
    %163 = vector.extract_strided_slice %160 {offsets = [0, 128], sizes = [8, 64], strides = [1, 1]} : vector<8x256xf32> to vector<8x64xf32>
    %164 = vector.extract_strided_slice %160 {offsets = [0, 192], sizes = [8, 64], strides = [1, 1]} : vector<8x256xf32> to vector<8x64xf32>
    %165 = arith.mulf %5, %138 : vector<8x64xf32>
    %166 = arith.addf %162, %165 : vector<8x64xf32>
    %167 = arith.addf %166, %11 : vector<8x64xf32>
    %168 = arith.negf %167 : vector<8x64xf32>
    %169 = math.exp %168 : vector<8x64xf32>
    %cst_43 = arith.constant 1.000000e+00 : f32
    %170 = vector.broadcast %cst_43 : f32 to vector<8x64xf32>
    %171 = arith.addf %170, %169 : vector<8x64xf32>
    %172 = arith.divf %170, %171 : vector<8x64xf32>
    %173 = arith.mulf %8, %138 : vector<8x64xf32>
    %174 = arith.addf %163, %173 : vector<8x64xf32>
    %175 = arith.addf %174, %14 : vector<8x64xf32>
    %176 = arith.negf %175 : vector<8x64xf32>
    %177 = math.exp %176 : vector<8x64xf32>
    %cst_44 = arith.constant 1.000000e+00 : f32
    %178 = vector.broadcast %cst_44 : f32 to vector<8x64xf32>
    %179 = arith.addf %178, %177 : vector<8x64xf32>
    %180 = arith.divf %178, %179 : vector<8x64xf32>
    %181 = arith.mulf %172, %138 : vector<8x64xf32>
    %cst_45 = arith.constant 1.000000e+00 : f32
    %182 = vector.broadcast %cst_45 : f32 to vector<8x64xf32>
    %183 = arith.subf %182, %172 : vector<8x64xf32>
    %184 = arith.mulf %183, %161 : vector<8x64xf32>
    %185 = arith.addf %181, %184 : vector<8x64xf32>
    %186 = arith.mulf %180, %185 : vector<8x64xf32>
    %cst_46 = arith.constant 1.000000e+00 : f32
    %187 = vector.broadcast %cst_46 : f32 to vector<8x64xf32>
    %188 = arith.subf %187, %180 : vector<8x64xf32>
    %189 = arith.mulf %188, %164 : vector<8x64xf32>
    %190 = arith.addf %186, %189 : vector<8x64xf32>
    %191 = vector.extract_strided_slice %190 {offsets = [0, 0], sizes = [8, 32], strides = [1, 1]} : vector<8x64xf32> to vector<8x32xf32>
    %192 = arith.truncf %191 : vector<8x32xf32> to vector<8x32xbf16>
    %193 = arith.index_cast %c3_i32 : i32 to index
    %c0_47 = arith.constant 0 : index
    %c0_48 = arith.constant 0 : index
    %194 = vector.load %arg4[%193, %c0_47, %c0_48] : memref<8x8x32xbf16, #tpu.memory_space<vmem>>, vector<1x8x32xbf16>
    %195 = vector.shape_cast %194 : vector<1x8x32xbf16> to vector<8x32xbf16>
    %196 = vector.shape_cast %192 : vector<8x32xbf16> to vector<1x8x32xbf16>
    tpu.vector_store %arg4[%193, %c0_47, %c0_48], %196 {strides = array<i32>} : memref<8x8x32xbf16, #tpu.memory_space<vmem>>, vector<1x8x32xbf16>,
    %197 = vector.extract_strided_slice %190 {offsets = [0, 32], sizes = [8, 32], strides = [1, 1]} : vector<8x64xf32> to vector<8x32xf32>
    %198 = arith.truncf %197 : vector<8x32xf32> to vector<8x32xbf16>
    %c7_i32_49 = arith.constant 7 : i32
    %199 = arith.subi %c7_i32_49, %c3_i32 : i32
    %200 = arith.index_cast %199 : i32 to index
    %c0_50 = arith.constant 0 : index
    %c0_51 = arith.constant 0 : index
    %201 = vector.load %arg5[%200, %c0_50, %c0_51] : memref<8x8x32xbf16, #tpu.memory_space<vmem>>, vector<1x8x32xbf16>
    %202 = vector.shape_cast %201 : vector<1x8x32xbf16> to vector<8x32xbf16>
    %203 = vector.shape_cast %198 : vector<8x32xbf16> to vector<1x8x32xbf16>
    tpu.vector_store %arg5[%200, %c0_50, %c0_51], %203 {strides = array<i32>} : memref<8x8x32xbf16, #tpu.memory_space<vmem>>, vector<1x8x32xbf16>,
    %c4_i32 = arith.constant 4 : i32
    %204 = arith.index_cast %c4_i32 : i32 to index
    %c0_52 = arith.constant 0 : index
    %c0_53 = arith.constant 0 : index
    %205 = vector.load %arg1[%204, %c0_52, %c0_53] : memref<8x8x256xbf16, #tpu.memory_space<vmem>>, vector<1x8x256xbf16>
    %206 = vector.shape_cast %205 : vector<1x8x256xbf16> to vector<8x256xbf16>
    %207 = arith.extf %206 : vector<8x256xbf16> to vector<8x256xf32>
    %208 = vector.extract_strided_slice %207 {offsets = [0, 0], sizes = [8, 64], strides = [1, 1]} : vector<8x256xf32> to vector<8x64xf32>
    %209 = vector.extract_strided_slice %207 {offsets = [0, 64], sizes = [8, 64], strides = [1, 1]} : vector<8x256xf32> to vector<8x64xf32>
    %210 = vector.extract_strided_slice %207 {offsets = [0, 128], sizes = [8, 64], strides = [1, 1]} : vector<8x256xf32> to vector<8x64xf32>
    %211 = vector.extract_strided_slice %207 {offsets = [0, 192], sizes = [8, 64], strides = [1, 1]} : vector<8x256xf32> to vector<8x64xf32>
    %212 = arith.mulf %5, %185 : vector<8x64xf32>
    %213 = arith.addf %209, %212 : vector<8x64xf32>
    %214 = arith.addf %213, %11 : vector<8x64xf32>
    %215 = arith.negf %214 : vector<8x64xf32>
    %216 = math.exp %215 : vector<8x64xf32>
    %cst_54 = arith.constant 1.000000e+00 : f32
    %217 = vector.broadcast %cst_54 : f32 to vector<8x64xf32>
    %218 = arith.addf %217, %216 : vector<8x64xf32>
    %219 = arith.divf %217, %218 : vector<8x64xf32>
    %220 = arith.mulf %8, %185 : vector<8x64xf32>
    %221 = arith.addf %210, %220 : vector<8x64xf32>
    %222 = arith.addf %221, %14 : vector<8x64xf32>
    %223 = arith.negf %222 : vector<8x64xf32>
    %224 = math.exp %223 : vector<8x64xf32>
    %cst_55 = arith.constant 1.000000e+00 : f32
    %225 = vector.broadcast %cst_55 : f32 to vector<8x64xf32>
    %226 = arith.addf %225, %224 : vector<8x64xf32>
    %227 = arith.divf %225, %226 : vector<8x64xf32>
    %228 = arith.mulf %219, %185 : vector<8x64xf32>
    %cst_56 = arith.constant 1.000000e+00 : f32
    %229 = vector.broadcast %cst_56 : f32 to vector<8x64xf32>
    %230 = arith.subf %229, %219 : vector<8x64xf32>
    %231 = arith.mulf %230, %208 : vector<8x64xf32>
    %232 = arith.addf %228, %231 : vector<8x64xf32>
    %233 = arith.mulf %227, %232 : vector<8x64xf32>
    %cst_57 = arith.constant 1.000000e+00 : f32
    %234 = vector.broadcast %cst_57 : f32 to vector<8x64xf32>
    %235 = arith.subf %234, %227 : vector<8x64xf32>
    %236 = arith.mulf %235, %211 : vector<8x64xf32>
    %237 = arith.addf %233, %236 : vector<8x64xf32>
    %238 = vector.extract_strided_slice %237 {offsets = [0, 0], sizes = [8, 32], strides = [1, 1]} : vector<8x64xf32> to vector<8x32xf32>
    %239 = arith.truncf %238 : vector<8x32xf32> to vector<8x32xbf16>
    %240 = arith.index_cast %c4_i32 : i32 to index
    %c0_58 = arith.constant 0 : index
    %c0_59 = arith.constant 0 : index
    %241 = vector.load %arg4[%240, %c0_58, %c0_59] : memref<8x8x32xbf16, #tpu.memory_space<vmem>>, vector<1x8x32xbf16>
    %242 = vector.shape_cast %241 : vector<1x8x32xbf16> to vector<8x32xbf16>
    %243 = vector.shape_cast %239 : vector<8x32xbf16> to vector<1x8x32xbf16>
    tpu.vector_store %arg4[%240, %c0_58, %c0_59], %243 {strides = array<i32>} : memref<8x8x32xbf16, #tpu.memory_space<vmem>>, vector<1x8x32xbf16>,
    %244 = vector.extract_strided_slice %237 {offsets = [0, 32], sizes = [8, 32], strides = [1, 1]} : vector<8x64xf32> to vector<8x32xf32>
    %245 = arith.truncf %244 : vector<8x32xf32> to vector<8x32xbf16>
    %c7_i32_60 = arith.constant 7 : i32
    %246 = arith.subi %c7_i32_60, %c4_i32 : i32
    %247 = arith.index_cast %246 : i32 to index
    %c0_61 = arith.constant 0 : index
    %c0_62 = arith.constant 0 : index
    %248 = vector.load %arg5[%247, %c0_61, %c0_62] : memref<8x8x32xbf16, #tpu.memory_space<vmem>>, vector<1x8x32xbf16>
    %249 = vector.shape_cast %248 : vector<1x8x32xbf16> to vector<8x32xbf16>
    %250 = vector.shape_cast %245 : vector<8x32xbf16> to vector<1x8x32xbf16>
    tpu.vector_store %arg5[%247, %c0_61, %c0_62], %250 {strides = array<i32>} : memref<8x8x32xbf16, #tpu.memory_space<vmem>>, vector<1x8x32xbf16>,
    %c5_i32 = arith.constant 5 : i32
    %251 = arith.index_cast %c5_i32 : i32 to index
    %c0_63 = arith.constant 0 : index
    %c0_64 = arith.constant 0 : index
    %252 = vector.load %arg1[%251, %c0_63, %c0_64] : memref<8x8x256xbf16, #tpu.memory_space<vmem>>, vector<1x8x256xbf16>
    %253 = vector.shape_cast %252 : vector<1x8x256xbf16> to vector<8x256xbf16>
    %254 = arith.extf %253 : vector<8x256xbf16> to vector<8x256xf32>
    %255 = vector.extract_strided_slice %254 {offsets = [0, 0], sizes = [8, 64], strides = [1, 1]} : vector<8x256xf32> to vector<8x64xf32>
    %256 = vector.extract_strided_slice %254 {offsets = [0, 64], sizes = [8, 64], strides = [1, 1]} : vector<8x256xf32> to vector<8x64xf32>
    %257 = vector.extract_strided_slice %254 {offsets = [0, 128], sizes = [8, 64], strides = [1, 1]} : vector<8x256xf32> to vector<8x64xf32>
    %258 = vector.extract_strided_slice %254 {offsets = [0, 192], sizes = [8, 64], strides = [1, 1]} : vector<8x256xf32> to vector<8x64xf32>
    %259 = arith.mulf %5, %232 : vector<8x64xf32>
    %260 = arith.addf %256, %259 : vector<8x64xf32>
    %261 = arith.addf %260, %11 : vector<8x64xf32>
    %262 = arith.negf %261 : vector<8x64xf32>
    %263 = math.exp %262 : vector<8x64xf32>
    %cst_65 = arith.constant 1.000000e+00 : f32
    %264 = vector.broadcast %cst_65 : f32 to vector<8x64xf32>
    %265 = arith.addf %264, %263 : vector<8x64xf32>
    %266 = arith.divf %264, %265 : vector<8x64xf32>
    %267 = arith.mulf %8, %232 : vector<8x64xf32>
    %268 = arith.addf %257, %267 : vector<8x64xf32>
    %269 = arith.addf %268, %14 : vector<8x64xf32>
    %270 = arith.negf %269 : vector<8x64xf32>
    %271 = math.exp %270 : vector<8x64xf32>
    %cst_66 = arith.constant 1.000000e+00 : f32
    %272 = vector.broadcast %cst_66 : f32 to vector<8x64xf32>
    %273 = arith.addf %272, %271 : vector<8x64xf32>
    %274 = arith.divf %272, %273 : vector<8x64xf32>
    %275 = arith.mulf %266, %232 : vector<8x64xf32>
    %cst_67 = arith.constant 1.000000e+00 : f32
    %276 = vector.broadcast %cst_67 : f32 to vector<8x64xf32>
    %277 = arith.subf %276, %266 : vector<8x64xf32>
    %278 = arith.mulf %277, %255 : vector<8x64xf32>
    %279 = arith.addf %275, %278 : vector<8x64xf32>
    %280 = arith.mulf %274, %279 : vector<8x64xf32>
    %cst_68 = arith.constant 1.000000e+00 : f32
    %281 = vector.broadcast %cst_68 : f32 to vector<8x64xf32>
    %282 = arith.subf %281, %274 : vector<8x64xf32>
    %283 = arith.mulf %282, %258 : vector<8x64xf32>
    %284 = arith.addf %280, %283 : vector<8x64xf32>
    %285 = vector.extract_strided_slice %284 {offsets = [0, 0], sizes = [8, 32], strides = [1, 1]} : vector<8x64xf32> to vector<8x32xf32>
    %286 = arith.truncf %285 : vector<8x32xf32> to vector<8x32xbf16>
    %287 = arith.index_cast %c5_i32 : i32 to index
    %c0_69 = arith.constant 0 : index
    %c0_70 = arith.constant 0 : index
    %288 = vector.load %arg4[%287, %c0_69, %c0_70] : memref<8x8x32xbf16, #tpu.memory_space<vmem>>, vector<1x8x32xbf16>
    %289 = vector.shape_cast %288 : vector<1x8x32xbf16> to vector<8x32xbf16>
    %290 = vector.shape_cast %286 : vector<8x32xbf16> to vector<1x8x32xbf16>
    tpu.vector_store %arg4[%287, %c0_69, %c0_70], %290 {strides = array<i32>} : memref<8x8x32xbf16, #tpu.memory_space<vmem>>, vector<1x8x32xbf16>,
    %291 = vector.extract_strided_slice %284 {offsets = [0, 32], sizes = [8, 32], strides = [1, 1]} : vector<8x64xf32> to vector<8x32xf32>
    %292 = arith.truncf %291 : vector<8x32xf32> to vector<8x32xbf16>
    %c7_i32_71 = arith.constant 7 : i32
    %293 = arith.subi %c7_i32_71, %c5_i32 : i32
    %294 = arith.index_cast %293 : i32 to index
    %c0_72 = arith.constant 0 : index
    %c0_73 = arith.constant 0 : index
    %295 = vector.load %arg5[%294, %c0_72, %c0_73] : memref<8x8x32xbf16, #tpu.memory_space<vmem>>, vector<1x8x32xbf16>
    %296 = vector.shape_cast %295 : vector<1x8x32xbf16> to vector<8x32xbf16>
    %297 = vector.shape_cast %292 : vector<8x32xbf16> to vector<1x8x32xbf16>
    tpu.vector_store %arg5[%294, %c0_72, %c0_73], %297 {strides = array<i32>} : memref<8x8x32xbf16, #tpu.memory_space<vmem>>, vector<1x8x32xbf16>,
    %c6_i32 = arith.constant 6 : i32
    %298 = arith.index_cast %c6_i32 : i32 to index
    %c0_74 = arith.constant 0 : index
    %c0_75 = arith.constant 0 : index
    %299 = vector.load %arg1[%298, %c0_74, %c0_75] : memref<8x8x256xbf16, #tpu.memory_space<vmem>>, vector<1x8x256xbf16>
    %300 = vector.shape_cast %299 : vector<1x8x256xbf16> to vector<8x256xbf16>
    %301 = arith.extf %300 : vector<8x256xbf16> to vector<8x256xf32>
    %302 = vector.extract_strided_slice %301 {offsets = [0, 0], sizes = [8, 64], strides = [1, 1]} : vector<8x256xf32> to vector<8x64xf32>
    %303 = vector.extract_strided_slice %301 {offsets = [0, 64], sizes = [8, 64], strides = [1, 1]} : vector<8x256xf32> to vector<8x64xf32>
    %304 = vector.extract_strided_slice %301 {offsets = [0, 128], sizes = [8, 64], strides = [1, 1]} : vector<8x256xf32> to vector<8x64xf32>
    %305 = vector.extract_strided_slice %301 {offsets = [0, 192], sizes = [8, 64], strides = [1, 1]} : vector<8x256xf32> to vector<8x64xf32>
    %306 = arith.mulf %5, %279 : vector<8x64xf32>
    %307 = arith.addf %303, %306 : vector<8x64xf32>
    %308 = arith.addf %307, %11 : vector<8x64xf32>
    %309 = arith.negf %308 : vector<8x64xf32>
    %310 = math.exp %309 : vector<8x64xf32>
    %cst_76 = arith.constant 1.000000e+00 : f32
    %311 = vector.broadcast %cst_76 : f32 to vector<8x64xf32>
    %312 = arith.addf %311, %310 : vector<8x64xf32>
    %313 = arith.divf %311, %312 : vector<8x64xf32>
    %314 = arith.mulf %8, %279 : vector<8x64xf32>
    %315 = arith.addf %304, %314 : vector<8x64xf32>
    %316 = arith.addf %315, %14 : vector<8x64xf32>
    %317 = arith.negf %316 : vector<8x64xf32>
    %318 = math.exp %317 : vector<8x64xf32>
    %cst_77 = arith.constant 1.000000e+00 : f32
    %319 = vector.broadcast %cst_77 : f32 to vector<8x64xf32>
    %320 = arith.addf %319, %318 : vector<8x64xf32>
    %321 = arith.divf %319, %320 : vector<8x64xf32>
    %322 = arith.mulf %313, %279 : vector<8x64xf32>
    %cst_78 = arith.constant 1.000000e+00 : f32
    %323 = vector.broadcast %cst_78 : f32 to vector<8x64xf32>
    %324 = arith.subf %323, %313 : vector<8x64xf32>
    %325 = arith.mulf %324, %302 : vector<8x64xf32>
    %326 = arith.addf %322, %325 : vector<8x64xf32>
    %327 = arith.mulf %321, %326 : vector<8x64xf32>
    %cst_79 = arith.constant 1.000000e+00 : f32
    %328 = vector.broadcast %cst_79 : f32 to vector<8x64xf32>
    %329 = arith.subf %328, %321 : vector<8x64xf32>
    %330 = arith.mulf %329, %305 : vector<8x64xf32>
    %331 = arith.addf %327, %330 : vector<8x64xf32>
    %332 = vector.extract_strided_slice %331 {offsets = [0, 0], sizes = [8, 32], strides = [1, 1]} : vector<8x64xf32> to vector<8x32xf32>
    %333 = arith.truncf %332 : vector<8x32xf32> to vector<8x32xbf16>
    %334 = arith.index_cast %c6_i32 : i32 to index
    %c0_80 = arith.constant 0 : index
    %c0_81 = arith.constant 0 : index
    %335 = vector.load %arg4[%334, %c0_80, %c0_81] : memref<8x8x32xbf16, #tpu.memory_space<vmem>>, vector<1x8x32xbf16>
    %336 = vector.shape_cast %335 : vector<1x8x32xbf16> to vector<8x32xbf16>
    %337 = vector.shape_cast %333 : vector<8x32xbf16> to vector<1x8x32xbf16>
    tpu.vector_store %arg4[%334, %c0_80, %c0_81], %337 {strides = array<i32>} : memref<8x8x32xbf16, #tpu.memory_space<vmem>>, vector<1x8x32xbf16>,
    %338 = vector.extract_strided_slice %331 {offsets = [0, 32], sizes = [8, 32], strides = [1, 1]} : vector<8x64xf32> to vector<8x32xf32>
    %339 = arith.truncf %338 : vector<8x32xf32> to vector<8x32xbf16>
    %c7_i32_82 = arith.constant 7 : i32
    %340 = arith.subi %c7_i32_82, %c6_i32 : i32
    %341 = arith.index_cast %340 : i32 to index
    %c0_83 = arith.constant 0 : index
    %c0_84 = arith.constant 0 : index
    %342 = vector.load %arg5[%341, %c0_83, %c0_84] : memref<8x8x32xbf16, #tpu.memory_space<vmem>>, vector<1x8x32xbf16>
    %343 = vector.shape_cast %342 : vector<1x8x32xbf16> to vector<8x32xbf16>
    %344 = vector.shape_cast %339 : vector<8x32xbf16> to vector<1x8x32xbf16>
    tpu.vector_store %arg5[%341, %c0_83, %c0_84], %344 {strides = array<i32>} : memref<8x8x32xbf16, #tpu.memory_space<vmem>>, vector<1x8x32xbf16>,
    %c7_i32_85 = arith.constant 7 : i32
    %345 = arith.index_cast %c7_i32_85 : i32 to index
    %c0_86 = arith.constant 0 : index
    %c0_87 = arith.constant 0 : index
    %346 = vector.load %arg1[%345, %c0_86, %c0_87] : memref<8x8x256xbf16, #tpu.memory_space<vmem>>, vector<1x8x256xbf16>
    %347 = vector.shape_cast %346 : vector<1x8x256xbf16> to vector<8x256xbf16>
    %348 = arith.extf %347 : vector<8x256xbf16> to vector<8x256xf32>
    %349 = vector.extract_strided_slice %348 {offsets = [0, 0], sizes = [8, 64], strides = [1, 1]} : vector<8x256xf32> to vector<8x64xf32>
    %350 = vector.extract_strided_slice %348 {offsets = [0, 64], sizes = [8, 64], strides = [1, 1]} : vector<8x256xf32> to vector<8x64xf32>
    %351 = vector.extract_strided_slice %348 {offsets = [0, 128], sizes = [8, 64], strides = [1, 1]} : vector<8x256xf32> to vector<8x64xf32>
    %352 = vector.extract_strided_slice %348 {offsets = [0, 192], sizes = [8, 64], strides = [1, 1]} : vector<8x256xf32> to vector<8x64xf32>
    %353 = arith.mulf %5, %326 : vector<8x64xf32>
    %354 = arith.addf %350, %353 : vector<8x64xf32>
    %355 = arith.addf %354, %11 : vector<8x64xf32>
    %356 = arith.negf %355 : vector<8x64xf32>
    %357 = math.exp %356 : vector<8x64xf32>
    %cst_88 = arith.constant 1.000000e+00 : f32
    %358 = vector.broadcast %cst_88 : f32 to vector<8x64xf32>
    %359 = arith.addf %358, %357 : vector<8x64xf32>
    %360 = arith.divf %358, %359 : vector<8x64xf32>
    %361 = arith.mulf %8, %326 : vector<8x64xf32>
    %362 = arith.addf %351, %361 : vector<8x64xf32>
    %363 = arith.addf %362, %14 : vector<8x64xf32>
    %364 = arith.negf %363 : vector<8x64xf32>
    %365 = math.exp %364 : vector<8x64xf32>
    %cst_89 = arith.constant 1.000000e+00 : f32
    %366 = vector.broadcast %cst_89 : f32 to vector<8x64xf32>
    %367 = arith.addf %366, %365 : vector<8x64xf32>
    %368 = arith.divf %366, %367 : vector<8x64xf32>
    %369 = arith.mulf %360, %326 : vector<8x64xf32>
    %cst_90 = arith.constant 1.000000e+00 : f32
    %370 = vector.broadcast %cst_90 : f32 to vector<8x64xf32>
    %371 = arith.subf %370, %360 : vector<8x64xf32>
    %372 = arith.mulf %371, %349 : vector<8x64xf32>
    %373 = arith.addf %369, %372 : vector<8x64xf32>
    %374 = arith.mulf %368, %373 : vector<8x64xf32>
    %cst_91 = arith.constant 1.000000e+00 : f32
    %375 = vector.broadcast %cst_91 : f32 to vector<8x64xf32>
    %376 = arith.subf %375, %368 : vector<8x64xf32>
    %377 = arith.mulf %376, %352 : vector<8x64xf32>
    %378 = arith.addf %374, %377 : vector<8x64xf32>
    %379 = vector.extract_strided_slice %378 {offsets = [0, 0], sizes = [8, 32], strides = [1, 1]} : vector<8x64xf32> to vector<8x32xf32>
    %380 = arith.truncf %379 : vector<8x32xf32> to vector<8x32xbf16>
    %381 = arith.index_cast %c7_i32_85 : i32 to index
    %c0_92 = arith.constant 0 : index
    %c0_93 = arith.constant 0 : index
    %382 = vector.load %arg4[%381, %c0_92, %c0_93] : memref<8x8x32xbf16, #tpu.memory_space<vmem>>, vector<1x8x32xbf16>
    %383 = vector.shape_cast %382 : vector<1x8x32xbf16> to vector<8x32xbf16>
    %384 = vector.shape_cast %380 : vector<8x32xbf16> to vector<1x8x32xbf16>
    tpu.vector_store %arg4[%381, %c0_92, %c0_93], %384 {strides = array<i32>} : memref<8x8x32xbf16, #tpu.memory_space<vmem>>, vector<1x8x32xbf16>,
    %385 = vector.extract_strided_slice %378 {offsets = [0, 32], sizes = [8, 32], strides = [1, 1]} : vector<8x64xf32> to vector<8x32xf32>
    %386 = arith.truncf %385 : vector<8x32xf32> to vector<8x32xbf16>
    %c7_i32_94 = arith.constant 7 : i32
    %387 = arith.subi %c7_i32_94, %c7_i32_85 : i32
    %388 = arith.index_cast %387 : i32 to index
    %c0_95 = arith.constant 0 : index
    %c0_96 = arith.constant 0 : index
    %389 = vector.load %arg5[%388, %c0_95, %c0_96] : memref<8x8x32xbf16, #tpu.memory_space<vmem>>, vector<1x8x32xbf16>
    %390 = vector.shape_cast %389 : vector<1x8x32xbf16> to vector<8x32xbf16>
    %391 = vector.shape_cast %386 : vector<8x32xbf16> to vector<1x8x32xbf16>
    tpu.vector_store %arg5[%388, %c0_95, %c0_96], %391 {strides = array<i32>} : memref<8x8x32xbf16, #tpu.memory_space<vmem>>, vector<1x8x32xbf16>,
    %c8_i32 = arith.constant 8 : i32
    %c0_97 = arith.constant 0 : index
    %c0_98 = arith.constant 0 : index
    %392 = vector.load %arg6[%c0_97, %c0_98] : memref<8x64xf32, #tpu.memory_space<vmem>>, vector<8x64xf32>
    tpu.vector_store %arg6[%c0_97, %c0_98], %373 {strides = array<i32>} : memref<8x64xf32, #tpu.memory_space<vmem>>, vector<8x64xf32>,
    return
  }
  func.func @transform_0(%arg0: i32) -> (i32, i32, i32) {
    %c0_i32 = arith.constant 0 : i32
    %c0_i32_0 = arith.constant 0 : i32
    %c0_i32_1 = arith.constant 0 : i32
    return %arg0, %c0_i32, %c0_i32_0 : i32, i32, i32
  }
  func.func @transform_1(%arg0: i32) -> (i32, i32) {
    %c0_i32 = arith.constant 0 : i32
    %c0_i32_0 = arith.constant 0 : i32
    %c0_i32_1 = arith.constant 0 : i32
    return %c0_i32, %c0_i32_0 : i32, i32
  }
  func.func @transform_2(%arg0: i32) -> (i32, i32) {
    %c0_i32 = arith.constant 0 : i32
    %c0_i32_0 = arith.constant 0 : i32
    %c0_i32_1 = arith.constant 0 : i32
    return %c0_i32, %c0_i32_0 : i32, i32
  }
  func.func @transform_3(%arg0: i32) -> (i32, i32, i32) {
    %c0_i32 = arith.constant 0 : i32
    %c0_i32_0 = arith.constant 0 : i32
    %c0_i32_1 = arith.constant 0 : i32
    return %arg0, %c0_i32, %c0_i32_0 : i32, i32, i32
  }
  func.func @transform_4(%arg0: i32) -> (i32, i32, i32) {
    %c0_i32 = arith.constant 0 : i32
    %0 = arith.subi %c0_i32, %arg0 : i32
    %c0_i32_0 = arith.constant 0 : i32
    %c0_i32_1 = arith.constant 0 : i32
    %c0_i32_2 = arith.constant 0 : i32
    return %0, %c0_i32_0, %c0_i32_1 : i32, i32, i32
  }
}

module attributes {stable_mosaic.version = 11 : i64} {
  func.func @_frontend_kernel(%arg0: i32, %arg1: memref<64x16xf32, #tpu.memory_space<vmem>>, %arg2: memref<64x16xf32, #tpu.memory_space<vmem>>, %arg3: memref<16x32xbf16, #tpu.memory_space<vmem>>, %arg4: memref<1x32xf32, #tpu.memory_space<vmem>>, %arg5: memref<1x32xf32, #tpu.memory_space<vmem>>, %arg6: memref<64x256xbf16, #tpu.memory_space<vmem>>, %arg7: memref<64x256xbf16, #tpu.memory_space<vmem>>, %arg8: memref<64x32xf32, #tpu.memory_space<vmem>>) attributes {dimension_semantics = [#tpu.dimension_semantics<parallel>], iteration_bounds = array<i64: 1>, scalar_prefetch = 0 : i64, scratch_operands = 0 : i64, tpu.core_type = #tpu.core_type<tc>, window_params = [{transform_indices = @transform_0, window_bounds = array<i64: 64, 16>}, {transform_indices = @transform_1, window_bounds = array<i64: 64, 16>}, {pipeline_mode = #tpu.pipeline_mode<synchronous>, transform_indices = @transform_2, window_bounds = array<i64: 16, 32>}, {pipeline_mode = #tpu.pipeline_mode<synchronous>, transform_indices = @transform_3, window_bounds = array<i64: 1, 32>}, {pipeline_mode = #tpu.pipeline_mode<synchronous>, transform_indices = @transform_4, window_bounds = array<i64: 1, 32>}, {pipeline_mode = #tpu.pipeline_mode<synchronous>, transform_indices = @transform_5, window_bounds = array<i64: 64, 256>}, {transform_indices = @transform_6, window_bounds = array<i64: 64, 256>}, {transform_indices = @transform_7, window_bounds = array<i64: 64, 32>}]} {
    %c0 = arith.constant 0 : index
    %c0_0 = arith.constant 0 : index
    %0 = vector.load %arg1[%c0, %c0_0] : memref<64x16xf32, #tpu.memory_space<vmem>>, vector<64x16xf32>
    %1 = arith.truncf %0 : vector<64x16xf32> to vector<64x16xbf16>
    %c0_1 = arith.constant 0 : index
    %c0_2 = arith.constant 0 : index
    %2 = vector.load %arg3[%c0_1, %c0_2] : memref<16x32xbf16, #tpu.memory_space<vmem>>, vector<16x32xbf16>
    %cst = arith.constant dense<0.000000e+00> : vector<64x32xf32>
    %3 = tpu.matmul %1, %2, %cst {dimension_numbers = #tpu.dot_dimension_numbers<[1], [0], [0], [1], [0, 0, 1, 1], [], []>} : vector<64x16xbf16>, vector<16x32xbf16>, vector<64x32xf32> -> vector<64x32xf32>
    %cst_3 = arith.constant dense<0.000000e+00> : vector<64xf32>
    %4 = vector.multi_reduction <add>, %3, %cst_3 [1] : vector<64x32xf32> to vector<64xf32>
    %5 = vector.shape_cast %4 : vector<64xf32> to vector<64x1xf32>
    %cst_4 = arith.constant 3.200000e+01 : f32
    %6 = vector.broadcast %cst_4 : f32 to vector<64x1xf32>
    %7 = arith.divf %5, %6 : vector<64x1xf32>
    %8 = vector.broadcast %7 : vector<64x1xf32> to vector<64x32xf32>
    %9 = arith.subf %3, %8 : vector<64x32xf32>
    %10 = arith.mulf %9, %9 : vector<64x32xf32>
    %cst_5 = arith.constant dense<0.000000e+00> : vector<64xf32>
    %11 = vector.multi_reduction <add>, %10, %cst_5 [1] : vector<64x32xf32> to vector<64xf32>
    %12 = vector.shape_cast %11 : vector<64xf32> to vector<64x1xf32>
    %cst_6 = arith.constant 3.200000e+01 : f32
    %13 = vector.broadcast %cst_6 : f32 to vector<64x1xf32>
    %14 = arith.divf %12, %13 : vector<64x1xf32>
    %15 = vector.broadcast %7 : vector<64x1xf32> to vector<64x32xf32>
    %16 = arith.subf %3, %15 : vector<64x32xf32>
    %cst_7 = arith.constant 9.99999974E-6 : f32
    %17 = vector.broadcast %cst_7 : f32 to vector<64x1xf32>
    %18 = arith.addf %14, %17 : vector<64x1xf32>
    %19 = math.rsqrt %18 : vector<64x1xf32>
    %20 = vector.broadcast %19 : vector<64x1xf32> to vector<64x32xf32>
    %21 = arith.mulf %16, %20 : vector<64x32xf32>
    %c0_8 = arith.constant 0 : index
    %c0_9 = arith.constant 0 : index
    %22 = vector.load %arg4[%c0_8, %c0_9] : memref<1x32xf32, #tpu.memory_space<vmem>>, vector<1x32xf32>
    %23 = vector.broadcast %22 : vector<1x32xf32> to vector<64x32xf32>
    %24 = arith.mulf %21, %23 : vector<64x32xf32>
    %c0_10 = arith.constant 0 : index
    %c0_11 = arith.constant 0 : index
    %25 = vector.load %arg5[%c0_10, %c0_11] : memref<1x32xf32, #tpu.memory_space<vmem>>, vector<1x32xf32>
    %26 = vector.broadcast %25 : vector<1x32xf32> to vector<64x32xf32>
    %27 = arith.addf %24, %26 : vector<64x32xf32>
    %c0_12 = arith.constant 0 : index
    %c0_13 = arith.constant 0 : index
    %28 = vector.load %arg2[%c0_12, %c0_13] : memref<64x16xf32, #tpu.memory_space<vmem>>, vector<64x16xf32>
    %29 = arith.truncf %28 : vector<64x16xf32> to vector<64x16xbf16>
    %c0_14 = arith.constant 0 : index
    %c0_15 = arith.constant 0 : index
    %30 = vector.load %arg3[%c0_14, %c0_15] : memref<16x32xbf16, #tpu.memory_space<vmem>>, vector<16x32xbf16>
    %cst_16 = arith.constant dense<0.000000e+00> : vector<64x32xf32>
    %31 = tpu.matmul %29, %30, %cst_16 {dimension_numbers = #tpu.dot_dimension_numbers<[1], [0], [0], [1], [0, 0, 1, 1], [], []>} : vector<64x16xbf16>, vector<16x32xbf16>, vector<64x32xf32> -> vector<64x32xf32>
    %cst_17 = arith.constant dense<0.000000e+00> : vector<64xf32>
    %32 = vector.multi_reduction <add>, %31, %cst_17 [1] : vector<64x32xf32> to vector<64xf32>
    %33 = vector.shape_cast %32 : vector<64xf32> to vector<64x1xf32>
    %cst_18 = arith.constant 3.200000e+01 : f32
    %34 = vector.broadcast %cst_18 : f32 to vector<64x1xf32>
    %35 = arith.divf %33, %34 : vector<64x1xf32>
    %36 = vector.broadcast %35 : vector<64x1xf32> to vector<64x32xf32>
    %37 = arith.subf %31, %36 : vector<64x32xf32>
    %38 = arith.mulf %37, %37 : vector<64x32xf32>
    %cst_19 = arith.constant dense<0.000000e+00> : vector<64xf32>
    %39 = vector.multi_reduction <add>, %38, %cst_19 [1] : vector<64x32xf32> to vector<64xf32>
    %40 = vector.shape_cast %39 : vector<64xf32> to vector<64x1xf32>
    %cst_20 = arith.constant 3.200000e+01 : f32
    %41 = vector.broadcast %cst_20 : f32 to vector<64x1xf32>
    %42 = arith.divf %40, %41 : vector<64x1xf32>
    %43 = vector.broadcast %35 : vector<64x1xf32> to vector<64x32xf32>
    %44 = arith.subf %31, %43 : vector<64x32xf32>
    %cst_21 = arith.constant 9.99999974E-6 : f32
    %45 = vector.broadcast %cst_21 : f32 to vector<64x1xf32>
    %46 = arith.addf %42, %45 : vector<64x1xf32>
    %47 = math.rsqrt %46 : vector<64x1xf32>
    %48 = vector.broadcast %47 : vector<64x1xf32> to vector<64x32xf32>
    %49 = arith.mulf %44, %48 : vector<64x32xf32>
    %c0_22 = arith.constant 0 : index
    %c0_23 = arith.constant 0 : index
    %50 = vector.load %arg4[%c0_22, %c0_23] : memref<1x32xf32, #tpu.memory_space<vmem>>, vector<1x32xf32>
    %51 = vector.broadcast %50 : vector<1x32xf32> to vector<64x32xf32>
    %52 = arith.mulf %49, %51 : vector<64x32xf32>
    %c0_24 = arith.constant 0 : index
    %c0_25 = arith.constant 0 : index
    %53 = vector.load %arg5[%c0_24, %c0_25] : memref<1x32xf32, #tpu.memory_space<vmem>>, vector<1x32xf32>
    %54 = vector.broadcast %53 : vector<1x32xf32> to vector<64x32xf32>
    %55 = arith.addf %52, %54 : vector<64x32xf32>
    %56 = tpu.concatenate %27, %55 in 1 : vector<64x32xf32>, vector<64x32xf32> -> vector<64x64xf32>
    %57 = arith.truncf %56 : vector<64x64xf32> to vector<64x64xbf16>
    %c0_26 = arith.constant 0 : index
    %c0_27 = arith.constant 0 : index
    %58 = vector.load %arg6[%c0_26, %c0_27] : memref<64x256xbf16, #tpu.memory_space<vmem>>, vector<64x256xbf16>
    %cst_28 = arith.constant dense<0.000000e+00> : vector<64x256xf32>
    %59 = tpu.matmul %57, %58, %cst_28 {dimension_numbers = #tpu.dot_dimension_numbers<[1], [0], [0], [1], [0, 0, 1, 1], [], []>} : vector<64x64xbf16>, vector<64x256xbf16>, vector<64x256xf32> -> vector<64x256xf32>
    %60 = arith.truncf %59 : vector<64x256xf32> to vector<64x256xbf16>
    %c0_29 = arith.constant 0 : index
    %c0_30 = arith.constant 0 : index
    %61 = vector.load %arg7[%c0_29, %c0_30] : memref<64x256xbf16, #tpu.memory_space<vmem>>, vector<64x256xbf16>
    tpu.vector_store %arg7[%c0_29, %c0_30], %60 {strides = array<i32>} : memref<64x256xbf16, #tpu.memory_space<vmem>>, vector<64x256xbf16>,
    %c0_31 = arith.constant 0 : index
    %c0_32 = arith.constant 0 : index
    %62 = vector.load %arg8[%c0_31, %c0_32] : memref<64x32xf32, #tpu.memory_space<vmem>>, vector<64x32xf32>
    tpu.vector_store %arg8[%c0_31, %c0_32], %3 {strides = array<i32>} : memref<64x32xf32, #tpu.memory_space<vmem>>, vector<64x32xf32>,
    return
  }
  func.func @transform_0(%arg0: i32) -> (i32, i32) {
    %c0_i32 = arith.constant 0 : i32
    %c0_i32_0 = arith.constant 0 : i32
    return %arg0, %c0_i32 : i32, i32
  }
  func.func @transform_1(%arg0: i32) -> (i32, i32) {
    %c0_i32 = arith.constant 0 : i32
    %c0_i32_0 = arith.constant 0 : i32
    return %arg0, %c0_i32 : i32, i32
  }
  func.func @transform_2(%arg0: i32) -> (i32, i32) {
    %c0_i32 = arith.constant 0 : i32
    %c0_i32_0 = arith.constant 0 : i32
    %c0_i32_1 = arith.constant 0 : i32
    return %c0_i32, %c0_i32_0 : i32, i32
  }
  func.func @transform_3(%arg0: i32) -> (i32, i32) {
    %c0_i32 = arith.constant 0 : i32
    %c0_i32_0 = arith.constant 0 : i32
    %c0_i32_1 = arith.constant 0 : i32
    return %c0_i32, %c0_i32_0 : i32, i32
  }
  func.func @transform_4(%arg0: i32) -> (i32, i32) {
    %c0_i32 = arith.constant 0 : i32
    %c0_i32_0 = arith.constant 0 : i32
    %c0_i32_1 = arith.constant 0 : i32
    return %c0_i32, %c0_i32_0 : i32, i32
  }
  func.func @transform_5(%arg0: i32) -> (i32, i32) {
    %c0_i32 = arith.constant 0 : i32
    %c0_i32_0 = arith.constant 0 : i32
    %c0_i32_1 = arith.constant 0 : i32
    return %c0_i32, %c0_i32_0 : i32, i32
  }
  func.func @transform_6(%arg0: i32) -> (i32, i32) {
    %c0_i32 = arith.constant 0 : i32
    %c0_i32_0 = arith.constant 0 : i32
    return %arg0, %c0_i32 : i32, i32
  }
  func.func @transform_7(%arg0: i32) -> (i32, i32) {
    %c0_i32 = arith.constant 0 : i32
    %c0_i32_0 = arith.constant 0 : i32
    return %arg0, %c0_i32 : i32, i32
  }
}

module attributes {stable_mosaic.version = 11 : i64} {
  func.func @_backend_kernel(%arg0: i32, %arg1: memref<64x32xbf16, #tpu.memory_space<vmem>>, %arg2: memref<64x32xbf16, #tpu.memory_space<vmem>>, %arg3: memref<64x32xf32, #tpu.memory_space<vmem>>, %arg4: memref<64x32xbf16, #tpu.memory_space<vmem>>, %arg5: memref<32x16xbf16, #tpu.memory_space<vmem>>, %arg6: memref<64x16xf32, #tpu.memory_space<vmem>>) attributes {dimension_semantics = [#tpu.dimension_semantics<parallel>], iteration_bounds = array<i64: 1>, scalar_prefetch = 0 : i64, scratch_operands = 0 : i64, tpu.core_type = #tpu.core_type<tc>, window_params = [{transform_indices = @transform_0, window_bounds = array<i64: 64, 32>}, {transform_indices = @transform_1, window_bounds = array<i64: 64, 32>}, {transform_indices = @transform_2, window_bounds = array<i64: 64, 32>}, {pipeline_mode = #tpu.pipeline_mode<synchronous>, transform_indices = @transform_3, window_bounds = array<i64: 64, 32>}, {pipeline_mode = #tpu.pipeline_mode<synchronous>, transform_indices = @transform_4, window_bounds = array<i64: 32, 16>}, {transform_indices = @transform_5, window_bounds = array<i64: 64, 16>}]} {
    %c0 = arith.constant 0 : index
    %c0_0 = arith.constant 0 : index
    %0 = vector.load %arg1[%c0, %c0_0] : memref<64x32xbf16, #tpu.memory_space<vmem>>, vector<64x32xbf16>
    %c0_1 = arith.constant 0 : index
    %c0_2 = arith.constant 0 : index
    %1 = vector.load %arg2[%c0_1, %c0_2] : memref<64x32xbf16, #tpu.memory_space<vmem>>, vector<64x32xbf16>
    %2 = tpu.concatenate %0, %1 in 1 : vector<64x32xbf16>, vector<64x32xbf16> -> vector<64x64xbf16>
    %c0_3 = arith.constant 0 : index
    %c0_4 = arith.constant 0 : index
    %3 = vector.load %arg4[%c0_3, %c0_4] : memref<64x32xbf16, #tpu.memory_space<vmem>>, vector<64x32xbf16>
    %cst = arith.constant dense<0.000000e+00> : vector<64x32xf32>
    %4 = tpu.matmul %2, %3, %cst {dimension_numbers = #tpu.dot_dimension_numbers<[1], [0], [0], [1], [0, 0, 1, 1], [], []>} : vector<64x64xbf16>, vector<64x32xbf16>, vector<64x32xf32> -> vector<64x32xf32>
    %c0_5 = arith.constant 0 : index
    %c0_6 = arith.constant 0 : index
    %5 = vector.load %arg3[%c0_5, %c0_6] : memref<64x32xf32, #tpu.memory_space<vmem>>, vector<64x32xf32>
    %6 = arith.mulf %5, %4 : vector<64x32xf32>
    %7 = arith.truncf %6 : vector<64x32xf32> to vector<64x32xbf16>
    %c0_7 = arith.constant 0 : index
    %c0_8 = arith.constant 0 : index
    %8 = vector.load %arg5[%c0_7, %c0_8] : memref<32x16xbf16, #tpu.memory_space<vmem>>, vector<32x16xbf16>
    %cst_9 = arith.constant dense<0.000000e+00> : vector<64x16xf32>
    %9 = tpu.matmul %7, %8, %cst_9 {dimension_numbers = #tpu.dot_dimension_numbers<[1], [0], [0], [1], [0, 0, 1, 1], [], []>} : vector<64x32xbf16>, vector<32x16xbf16>, vector<64x16xf32> -> vector<64x16xf32>
    %10 = math.tanh %9 : vector<64x16xf32>
    %c0_10 = arith.constant 0 : index
    %c0_11 = arith.constant 0 : index
    %11 = vector.load %arg6[%c0_10, %c0_11] : memref<64x16xf32, #tpu.memory_space<vmem>>, vector<64x16xf32>
    tpu.vector_store %arg6[%c0_10, %c0_11], %10 {strides = array<i32>} : memref<64x16xf32, #tpu.memory_space<vmem>>, vector<64x16xf32>,
    return
  }
  func.func @transform_0(%arg0: i32) -> (i32, i32) {
    %c0_i32 = arith.constant 0 : i32
    %c0_i32_0 = arith.constant 0 : i32
    return %arg0, %c0_i32 : i32, i32
  }
  func.func @transform_1(%arg0: i32) -> (i32, i32) {
    %c0_i32 = arith.constant 0 : i32
    %c0_i32_0 = arith.constant 0 : i32
    return %arg0, %c0_i32 : i32, i32
  }
  func.func @transform_2(%arg0: i32) -> (i32, i32) {
    %c0_i32 = arith.constant 0 : i32
    %c0_i32_0 = arith.constant 0 : i32
    return %arg0, %c0_i32 : i32, i32
  }
  func.func @transform_3(%arg0: i32) -> (i32, i32) {
    %c0_i32 = arith.constant 0 : i32
    %c0_i32_0 = arith.constant 0 : i32
    %c0_i32_1 = arith.constant 0 : i32
    return %c0_i32, %c0_i32_0 : i32, i32
  }
  func.func @transform_4(%arg0: i32) -> (i32, i32) {
    %c0_i32 = arith.constant 0 : i32
    %c0_i32_0 = arith.constant 0 : i32
    %c0_i32_1 = arith.constant 0 : i32
    return %c0_i32, %c0_i32_0 : i32, i32
  }
  func.func @transform_5(%arg0: i32) -> (i32, i32) {
    %c0_i32 = arith.constant 0 : i32
    %c0_i32_0 = arith.constant 0 : i32
    return %arg0, %c0_i32 : i32, i32
  }
}

</mosaic_0001>

<bundles_post_ra>
// kernel: conv_bsru_forward.5
= control target key start
LH: loop header
LB: loop body
LE: loop exit
PB: predicated region body
PF: predicated region fallthrough
CT: control target
= control target key end

     0   :  { %s433_s22 = smov 32   ;;  %vm85_vm0 = vcmask 261120   ;;  %vm130_vm1 = vcmask 523264   ;;  %vm325_vm2 = vcmask 130048   ;;  %s570_s1 = inlined_call_operand.vmem [shape: bf16[64,32], index: 1, kind: input, shape index: {}]   ;;  %s571_s3 = inlined_call_operand.vmem [shape: bf16[64,32], index: 3, kind: input, shape index: {}]   ;;  %s572_s0 = inlined_call_operand.vmem [shape: bf16[64,32], index: 0, kind: input, shape index: {}]   ;;  %s573_s4 = inlined_call_operand.vmem [shape: bf16[32,16], index: 4, kind: input, shape index: {}]   ;;  %s574_s2 = inlined_call_operand.vmem [shape: f32[64,32], index: 2, kind: input, shape index: {}]   ;;  %s575_s5 = inlined_call_operand.vmem [shape: f32[64,16], index: 5, kind: output, shape index: {}]  }
   0x1   :  { %v403_v0 = vld [vmem:[%s570_s1] sm:$0xff]   ;;  %v404_v1 = vld [vmem:[%s570_s1 + $0x8] sm:$0xff]   ;;  %v405_v2 = vld [vmem:[%s570_s1 + $0x10] sm:$0xff]  }
   0x2   :  { %77 = vrot.lane.b32.xlu0 %v403_v0, %s433_s22  ;;  %v406_v3 = vld [vmem:[%s570_s1 + $0x18] sm:$0xff]   ;;  %81 = vrot.lane.b32.xlu1 %v405_v2, %s433_s22  ;;  %v407_v4 = vld [vmem:[%s571_s3] sm:$0xff]  }
   0x3   :  { %v408_v5 = vld [vmem:[%s571_s3 + $0x8] sm:$0xff]   ;;  %374 = vmatprep.subr.bf16.mxu0 %v407_v4  ;;  %v409_v6 = vld [vmem:[%s571_s3 + $0x10] sm:$0xff]   ;;  %v410_v7 = vld [vmem:[%s571_s3 + $0x18] sm:$0xff]  }
   0x4   :  { %375 = vmatpush3.bf16.msra.mxu0 %v407_v4  ;;  %v411_v8 = vld [vmem:[%s572_s0] sm:$0xff]   ;;  %v413_v10 = vld [vmem:[%s572_s0 + $0x10] sm:$0xff]   ;;  %v412_v12 = vld [vmem:[%s572_s0 + $0x8] sm:$0xff]  }
   0x5   :  { %376 = vmatprep.subr.bf16.mxu0 %v408_v5  ;;  %v414_v17 = vld [vmem:[%s572_s0 + $0x18] sm:$0xff]   ;;  %v415_v20 = vld [vmem:[%s573_s4] sm:$0xff]   ;;  %v416_v21 = vld [vmem:[%s573_s4 + $0x8] sm:$0xff]  }
   0x6   :  { %79 = vrot.lane.b32.xlu0 %v404_v1, %s433_s22  ;;  %83 = vrot.lane.b32.xlu1 %v406_v3, %s433_s22  ;;  %v206_v23 = vld [vmem:[%s574_s2 + $0x10] sm:$0xff]  ;;  %v207_v24 = vld [vmem:[%s574_s2 + $0x18] sm:$0xff] }
   0x7   :  { %390 = vmatprep.subr.bf16.mxu1 %v415_v20  ;;  %v204_v26 = vld [vmem:[%s574_s2] sm:$0xff]  ;;  %v205_v27 = vld [vmem:[%s574_s2 + $0x8] sm:$0xff]  ;;  %v210_v37 = vld [vmem:[%s574_s2 + $0x30] sm:$0xff] }
   0x8   :  { %377 = vmatpush3.bf16.msra.mxu0 %v408_v5  ;;  %391 = vmatpush3.bf16.msra.mxu1 %v415_v20  ;;  %v211_v38 = vld [vmem:[%s574_s2 + $0x38] sm:$0xff]  ;;  %v208_v40 = vld [vmem:[%s574_s2 + $0x20] sm:$0xff]  ;;  %v209_v41 = vld [vmem:[%s574_s2 + $0x28] sm:$0xff] }
   0x9   :  { %378 = vmatprep.subr.bf16.mxu0 %v409_v6  ;;  %392 = vmatprep.subr.bf16.mxu1 %v416_v21 }
   0xc   :  { %379 = vmatpush3.bf16.msra.mxu0 %v409_v6  ;;  %393 = vmatpush3.bf16.msra.mxu1 %v416_v21 }
   0xd   :  { %380 = vmatprep.subr.bf16.mxu0 %v410_v7 }
  0x10   :  { %381 = vmatpush3.bf16.msra.mxu0 %v410_v7 }
  0x74   :  { %v78_v9 = vpop.permute.xlu0 %77  ;;  %v82_v13 = vpop.permute.xlu1 %81 }
  0x75   :  { %v88_v11 = vsel %vm85_vm0, %v411_v8, %v78_v9  ;;  %v94_v15 = vsel %vm85_vm0, %v413_v10, %v82_v13 }
  0x76   :  { %382 = vmatprep.mubr.msk.bf16.mxu0 %vm130_vm1, %v88_v11 }
  0x78   :  { %v80_v14 = vpop.permute.xlu0 %79  ;;  %v84_v18 = vpop.permute.xlu1 %83 }
  0x79   :  { %v91_v16 = vsel %vm85_vm0, %v412_v12, %v80_v14  ;;  %v97_v19 = vsel %vm85_vm0, %v414_v17, %v84_v18 }
  0x7a   :  { %383 = vmatmul.mubr.msk.bf16.vlgmr.msra.gmra.mrb[0].mxu0 %vm130_vm1, %v91_v16 }
  0x7b   :  { %386 = vmatprep.mubr.msk.bf16.mxu0 %vm130_vm1, %v94_v15 }
  0x82   :  { %387 = vmatmul.mubr.msk.bf16.gmra.mrb[4].mxu0 %vm130_vm1, %v97_v19 }
 0x14d   :  { %v384_v22 = vpop.f32.mrb[0].mxu0 }
 0x14e   :  { %v173_v25 = vpop.f32.mrb[1].mxu0  ;;  %v214_v29 = vmul.f32 %v384_v22, %v206_v23 }
 0x14f   :  { %v385_v28 = vpop.f32.mrb[2].mxu0  ;;  %v212_v32 = vmul.f32 %v204_v26, %v173_v25 }
 0x150   :  { %v215_v30 = vmul.f32 %v385_v28, %v207_v24  ;;  %v176_v31 = vpop.f32.mrb[3].mxu0 }
 0x151   :  { %v213_v33 = vmul.f32 %v205_v27, %v176_v31 }
 0x152   :  { %v221_v34 = vpack.c.bf16 %v215_v30, %v214_v29 }
 0x153   :  { %v220_v35 = vpack.c.bf16 %v213_v33, %v212_v32 }
 0x155   :  { %v388_v36 = vpop.f32.mrb[4].mxu0  ;;  %394 = vmatprep.mubr.msk.bf16.mxu1 %vm85_vm0, %v220_v35 }
 0x156   :  { %v189_v39 = vpop.f32.mrb[5].mxu0  ;;  %395 = vmatmul.mubr.msk.bf16.vlgmr.msra.gmra.mrb[0].mxu1 %vm85_vm0, %v221_v34  ;;  %v218_v43 = vmul.f32 %v388_v36, %v210_v37 }
 0x157   :  { %v389_v42 = vpop.f32.mrb[6].mxu0  ;;  %v216_v46 = vmul.f32 %v208_v40, %v189_v39 }
 0x158   :  { %v219_v44 = vmul.f32 %v389_v42, %v211_v38  ;;  %v192_v45 = vpop.f32.mrb[7].mxu0 }
 0x159   :  { %v217_v47 = vmul.f32 %v209_v41, %v192_v45 }
 0x15a   :  { %v223_v48 = vpack.c.bf16 %v219_v44, %v218_v43 }
 0x15b   :  { %v222_v49 = vpack.c.bf16 %v217_v47, %v216_v46 }
 0x15d   :  { %398 = vmatprep.mubr.msk.bf16.mxu1 %vm85_vm0, %v222_v49 }
 0x15e   :  { %399 = vmatmul.mubr.msk.bf16.gmra.mrb[4].mxu1 %vm85_vm0, %v223_v48 }
 0x229   :  { %v396_v50 = vpop.f32.mrb[0].mxu1 }
 0x22a   :  { %417 = vtanh.f32 %v396_v50  ;;  %v286_v51 = vpop.f32.mrb[1].mxu1 }
 0x22b   :  { %419 = vtanh.f32 %v286_v51  ;;  %v397_v52 = vpop.f32.mrb[2].mxu1 }
 0x22c   :  { %421 = vtanh.f32 %v397_v52  ;;  %v289_v53 = vpop.f32.mrb[3].mxu1 }
 0x22d   :  { %423 = vtanh.f32 %v289_v53 }
 0x231   :  { %v400_v54 = vpop.f32.mrb[4].mxu1 }
 0x232   :  { %425 = vtanh.f32 %v400_v54  ;;  %v302_v55 = vpop.f32.mrb[5].mxu1 }
 0x233   :  { %427 = vtanh.f32 %v302_v55  ;;  %v401_v56 = vpop.f32.mrb[6].mxu1 }
 0x234   :  { %v418_v57 = vpop.eup %417  ;;  %429 = vtanh.f32 %v401_v56  ;;  %v305_v58 = vpop.f32.mrb[7].mxu1 }
 0x235   :  { %v420_v59 = vpop.eup %419  ;;  %328 = vst.msk [vmem:[%s575_s5 + $0x10] sm:$0xff] %vm325_vm2, %v418_v57  ;;  %431 = vtanh.f32 %v305_v58 }
 0x236   :  { %v422_v60 = vpop.eup %421  ;;  %326 = vst.msk [vmem:[%s575_s5] sm:$0xff] %vm325_vm2, %v420_v59 }
 0x237   :  { %v424_v61 = vpop.eup %423  ;;  %329 = vst.msk [vmem:[%s575_s5 + $0x18] sm:$0xff] %vm325_vm2, %v422_v60 }
 0x238   :  { %327 = vst.msk [vmem:[%s575_s5 + $0x8] sm:$0xff] %vm325_vm2, %v424_v61 }
 0x23c   :  { %v426_v62 = vpop.eup %425 }
 0x23d   :  { %v428_v63 = vpop.eup %427  ;;  %332 = vst.msk [vmem:[%s575_s5 + $0x30] sm:$0xff] %vm325_vm2, %v426_v62 }
 0x23e   :  { %v430_v0 = vpop.eup %429  ;;  %330 = vst.msk [vmem:[%s575_s5 + $0x20] sm:$0xff] %vm325_vm2, %v428_v63 }
 0x23f   :  { %v432_v1 = vpop.eup %431  ;;  %333 = vst.msk [vmem:[%s575_s5 + $0x38] sm:$0xff] %vm325_vm2, %v430_v0 }
 0x240   :  { %331 = vst.msk [vmem:[%s575_s5 + $0x28] sm:$0xff] %vm325_vm2, %v432_v1 }

// kernel: conv_bsru_forward.4
= control target key start
LH: loop header
LB: loop body
LE: loop exit
PB: predicated region body
PF: predicated region fallthrough
CT: control target
= control target key end

     0   :  { %vm34_vm0 = vcmask 523264   ;;  %v695_v0 = vmov 0.0   ;;  %s696_s19 = smov 64   ;;  %vm111_vm1 = vcmask 257024   ;;  %s697_s17 = smov 96   ;;  %s1012_s1 = inlined_call_operand.vmem [shape: f32[2,64], index: 1, kind: input, shape index: {}]   ;;  %s1013_s0 = inlined_call_operand.vmem [shape: bf16[8,8,256], index: 0, kind: input, shape index: {}]   ;;  %s1014_s2 = inlined_call_operand.vmem [shape: f32[2,64], index: 2, kind: input, shape index: {}]   ;;  %s1015_s3 = inlined_call_operand.vmem [shape: bf16[8,8,32], index: 3, kind: output, shape index: {0}]   ;;  %s1016_s4 = inlined_call_operand.vmem [shape: bf16[8,8,32], index: 4, kind: output, shape index: {1}]  }
   0x1   :  { %35 = vst.msk [vmem:[#allocation2] sm:$0xff] %vm34_vm0, %v695_v0  ;;  %v727_v1 = vld [vmem:[%s1012_s1] ss:$0 sm:$0xff]  ;;  %v753_v21 = vld [vmem:[%s1013_s0 + $0x8] sm:$0xff]  ;;  %v767_v37 = vld [vmem:[%s1013_s0 + $0x10] sm:$0xff] }
   0x2   :  { %v732_v2 = vld [vmem:[%s1013_s0] sm:$0xff]  ;;  %v123_v22 = vunpack.c.l.bf16 %v753_v21  ;;  %v180_v38 = vunpack.c.l.bf16 %v767_v37  ;;  %v124_v41 = vunpack.c.h.bf16 %v753_v21  ;;  %v799_v0 = vld [vmem:[%s1013_s0 + $0x18] sm:$0xff] }
   0x3   :  { %v58_v5 = vunpack.c.l.bf16 %v732_v2  ;;  %v553_v6 = vld [vmem:[%s1014_s2] ss:$0 sm:$0xff]  ;;  %v775_v39 = vld [vmem:[%s1012_s1 + $0x1] ss:$0 sm:$0xff] }
   0x4   :  { %v785_v43 = vld [vmem:[%s1014_s2 + $0x1] ss:$0 sm:$0xff] }
   0x8   :  { %v734_v3 = vld [vmem:[#allocation2] sm:$0xff] }
   0x9   :  { %v60_v4 = vmul.f32 %v727_v1, %v734_v3  ;;  %87 = vrot.lane.b32.xlu1 %v734_v3, %s696_s19 }
   0xb   :  { %62 = vrot.lane.b32.xlu0 %v60_v4, %s696_s19  ;;  %v237_v4 = vunpack.c.l.bf16 %v799_v0 }
   0xd   :  { %93 = vrot.lane.b32.xlu1 %v58_v5, %s696_s19 }
   0xf   :  { %67 = vrot.lane.b32.xlu0 %v553_v6, %s696_s19  ;;  %v181_v6 = vunpack.c.h.bf16 %v767_v37 }
  0x7b   :  { %v88_v14 = vpop.permute.xlu1 %87 }
  0x7d   :  { %v63_v7 = vpop.permute.xlu0 %62 }
  0x7e   :  { %v65_v8 = vadd.f32 %v63_v7, %v58_v5 }
  0x7f   :  { %v94_v16 = vpop.permute.xlu1 %93 }
  0x81   :  { %v747_v9 = vpop.permute.xlu0 %67 }
  0x82   :  { %v70_v10 = vadd.f32 %v747_v9, %v65_v8 }
  0x84   :  { %v555_v11 = vmul.f32 -1.442695, %v70_v10 }
  0x86   :  { %631 = vpow2.f32 %v555_v11 }
  0x90   :  { %v632_v12 = vpop.eup %631 }
  0x91   :  { %v74_v13 = vadd.f32 1.0, %v632_v12 }
  0x93   :  { %633 = vrcp.f32 %v74_v13 }
  0x9d   :  { %v634_v15 = vpop.eup %633 }
  0x9e   :  { %v91_v17 = vsub.f32 1.0, %v634_v15  ;;  %v90_v18 = vmul.f32 %v634_v15, %v88_v14 }
  0xa0   :  { %v96_v19 = vmul.f32 %v94_v16, %v91_v17 }
  0xa2   :  { %v97_v20 = vadd.f32 %v96_v19, %v90_v18 }
  0xa4   :  { %99 = vrot.lane.b32.xlu0 %v97_v20, %s696_s19 }
  0xa8   :  { %150 = vrot.lane.b32.xlu0 %v123_v22, %s696_s19 }
 0x116   :  { %v758_v23 = vpop.permute.xlu0 %99 }
 0x117   :  { %v125_v24 = vmul.f32 %v727_v1, %v758_v23  ;;  %v138_v40 = vmul.f32 %v775_v39, %v758_v23 }
 0x119   :  { %127 = vrot.lane.b32.xlu1 %v125_v24, %s696_s19  ;;  %v139_v42 = vadd.f32 %v138_v40, %v124_v41 }
 0x11a   :  { %v151_v32 = vpop.permute.xlu0 %150 }
 0x11b   :  { %v140_v44 = vadd.f32 %v785_v43, %v139_v42 }
 0x11d   :  { %v561_v45 = vmul.f32 -1.442695, %v140_v44 }
 0x18b   :  { %v128_v25 = vpop.permute.xlu1 %127 }
 0x18c   :  { %v130_v26 = vadd.f32 %v128_v25, %v123_v22 }
 0x18e   :  { %v131_v27 = vadd.f32 %v130_v26, %v747_v9 }
 0x190   :  { %v560_v28 = vmul.f32 -1.442695, %v131_v27 }
 0x192   :  { %635 = vpow2.f32 %v560_v28 }
 0x19c   :  { %v636_v29 = vpop.eup %635 }
 0x19d   :  { %v135_v30 = vadd.f32 1.0, %v636_v29 }
 0x19f   :  { %637 = vrcp.f32 %v135_v30 }
 0x1a0   :  { %639 = vpow2.f32 %v561_v45 }
 0x1a9   :  { %v638_v31 = vpop.eup %637 }
 0x1aa   :  { %v148_v33 = vsub.f32 1.0, %v638_v31  ;;  %v147_v34 = vmul.f32 %v638_v31, %v97_v20  ;;  %v640_v46 = vpop.eup %639  ;;  %v820_v31 = vld [vmem:[%s1013_s0 + $0x20] sm:$0xff] }
 0x1ab   :  { %v144_v47 = vadd.f32 1.0, %v640_v46 }
 0x1ac   :  { %v153_v35 = vmul.f32 %v151_v32, %v148_v33  ;;  %v294_v32 = vunpack.c.l.bf16 %v820_v31 }
 0x1ad   :  { %641 = vrcp.f32 %v144_v47 }
 0x1ae   :  { %v154_v36 = vadd.f32 %v153_v35, %v147_v34  ;;  %v238_v34 = vunpack.c.h.bf16 %v799_v0  ;;  %v59_v0 = vunpack.c.h.bf16 %v732_v2 }
 0x1b0   :  { %156 = vrot.lane.b32.xlu1 %v154_v36, %s696_s19 }
 0x1b4   :  { %207 = vrot.lane.b32.xlu1 %v180_v38, %s696_s19 }
 0x1b7   :  { %v788_v48 = vpop.eup %641 }
 0x222   :  { %v157_v49 = vpop.permute.xlu1 %156 }
 0x223   :  { %v791_v50 = vmul.f32 %v788_v48, %v157_v49  ;;  %v182_v51 = vmul.f32 %v727_v1, %v157_v49  ;;  %v195_v5 = vmul.f32 %v775_v39, %v157_v49 }
 0x225   :  { %184 = vrot.lane.b32.xlu0 %v182_v51, %s696_s19  ;;  %v196_v7 = vadd.f32 %v195_v5, %v181_v6  ;;  %v295_v5 = vunpack.c.h.bf16 %v820_v31 }
 0x226   :  { %v208_v59 = vpop.permute.xlu1 %207 }
 0x227   :  { %v197_v8 = vadd.f32 %v785_v43, %v196_v7 }
 0x229   :  { %v567_v10 = vmul.f32 -1.442695, %v197_v8 }
 0x297   :  { %v185_v52 = vpop.permute.xlu0 %184 }
 0x298   :  { %v187_v53 = vadd.f32 %v185_v52, %v180_v38 }
 0x29a   :  { %v188_v54 = vadd.f32 %v187_v53, %v747_v9 }
 0x29c   :  { %v566_v55 = vmul.f32 -1.442695, %v188_v54 }
 0x29e   :  { %643 = vpow2.f32 %v566_v55 }
 0x2a8   :  { %v644_v56 = vpop.eup %643 }
 0x2a9   :  { %v192_v57 = vadd.f32 1.0, %v644_v56 }
 0x2ab   :  { %645 = vrcp.f32 %v192_v57 }
 0x2ac   :  { %647 = vpow2.f32 %v567_v10 }
 0x2b5   :  { %v646_v58 = vpop.eup %645 }
 0x2b6   :  { %v205_v60 = vsub.f32 1.0, %v646_v58  ;;  %v204_v61 = vmul.f32 %v646_v58, %v154_v36  ;;  %v648_v11 = vpop.eup %647 }
 0x2b7   :  { %v201_v12 = vadd.f32 1.0, %v648_v11 }
 0x2b8   :  { %v210_v62 = vmul.f32 %v208_v59, %v205_v60 }
 0x2b9   :  { %649 = vrcp.f32 %v201_v12 }
 0x2ba   :  { %v211_v63 = vadd.f32 %v210_v62, %v204_v61  ;;  %v841_v62 = vld [vmem:[%s1013_s0 + $0x28] sm:$0xff] }
 0x2bc   :  { %213 = vrot.lane.b32.xlu0 %v211_v63, %s696_s19 }
 0x2c0   :  { %264 = vrot.lane.b32.xlu0 %v237_v4, %s696_s19 }
 0x2c3   :  { %v809_v13 = vpop.eup %649 }
 0x32e   :  { %v214_v14 = vpop.permute.xlu0 %213 }
 0x32f   :  { %v812_v15 = vmul.f32 %v809_v13, %v214_v14  ;;  %v239_v16 = vmul.f32 %v727_v1, %v214_v14  ;;  %v252_v33 = vmul.f32 %v775_v39, %v214_v14 }
 0x331   :  { %241 = vrot.lane.b32.xlu1 %v239_v16, %s696_s19  ;;  %v253_v35 = vadd.f32 %v252_v33, %v238_v34 }
 0x332   :  { %v265_v26 = vpop.permute.xlu0 %264 }
 0x333   :  { %v254_v36 = vadd.f32 %v785_v43, %v253_v35  ;;  %v589_v35 = vld [vmem:[%s1013_s0 + $0x30] sm:$0xff] }
 0x335   :  { %v573_v38 = vmul.f32 -1.442695, %v254_v36  ;;  %v408_v36 = vunpack.c.l.bf16 %v589_v35 }
 0x3a3   :  { %v242_v17 = vpop.permute.xlu1 %241 }
 0x3a4   :  { %v244_v18 = vadd.f32 %v242_v17, %v237_v4 }
 0x3a6   :  { %v245_v19 = vadd.f32 %v244_v18, %v747_v9 }
 0x3a8   :  { %v572_v20 = vmul.f32 -1.442695, %v245_v19 }
 0x3aa   :  { %651 = vpow2.f32 %v572_v20 }
 0x3b4   :  { %v652_v22 = vpop.eup %651 }
 0x3b5   :  { %v249_v24 = vadd.f32 1.0, %v652_v22 }
 0x3b7   :  { %653 = vrcp.f32 %v249_v24 }
 0x3b8   :  { %655 = vpow2.f32 %v573_v38 }
 0x3c1   :  { %v654_v25 = vpop.eup %653 }
 0x3c2   :  { %v262_v27 = vsub.f32 1.0, %v654_v25  ;;  %v261_v28 = vmul.f32 %v654_v25, %v211_v63  ;;  %v656_v40 = vpop.eup %655  ;;  %v351_v63 = vunpack.c.l.bf16 %v841_v62 }
 0x3c3   :  { %v258_v42 = vadd.f32 1.0, %v656_v40  ;;  %v352_v40 = vunpack.c.h.bf16 %v841_v62 }
 0x3c4   :  { %v267_v29 = vmul.f32 %v265_v26, %v262_v27 }
 0x3c5   :  { %657 = vrcp.f32 %v258_v42 }
 0x3c6   :  { %v268_v30 = vadd.f32 %v267_v29, %v261_v28 }
 0x3c8   :  { %270 = vrot.lane.b32.xlu1 %v268_v30, %s696_s19 }
 0x3cc   :  { %321 = vrot.lane.b32.xlu1 %v294_v32, %s696_s19 }
 0x3cf   :  { %v830_v44 = vpop.eup %657 }
 0x3d0   :  { %v274_v2 = vsub.f32 1.0, %v830_v44 }
 0x43a   :  { %v271_v45 = vpop.permute.xlu1 %270 }
 0x43b   :  { %v833_v46 = vmul.f32 %v830_v44, %v271_v45  ;;  %v296_v47 = vmul.f32 %v727_v1, %v271_v45  ;;  %v309_v4 = vmul.f32 %v775_v39, %v271_v45 }
 0x43d   :  { %298 = vrot.lane.b32.xlu0 %v296_v47, %s696_s19  ;;  %v310_v7 = vadd.f32 %v309_v4, %v295_v5 }
 0x43e   :  { %v322_v57 = vpop.permute.xlu1 %321 }
 0x43f   :  { %v311_v8 = vadd.f32 %v785_v43, %v310_v7 }
 0x441   :  { %v579_v10 = vmul.f32 -1.442695, %v311_v8 }
 0x4af   :  { %v299_v49 = vpop.permute.xlu0 %298 }
 0x4b0   :  { %v301_v51 = vadd.f32 %v299_v49, %v294_v32 }
 0x4b2   :  { %v302_v52 = vadd.f32 %v301_v51, %v747_v9 }
 0x4b4   :  { %v578_v53 = vmul.f32 -1.442695, %v302_v52  ;;  %v409_v52 = vunpack.c.h.bf16 %v589_v35 }
 0x4b6   :  { %659 = vpow2.f32 %v578_v53 }
 0x4c0   :  { %v660_v54 = vpop.eup %659 }
 0x4c1   :  { %v306_v55 = vadd.f32 1.0, %v660_v54 }
 0x4c3   :  { %661 = vrcp.f32 %v306_v55 }
 0x4c4   :  { %663 = vpow2.f32 %v579_v10 }
 0x4cd   :  { %v662_v56 = vpop.eup %661 }
 0x4ce   :  { %v319_v58 = vsub.f32 1.0, %v662_v56  ;;  %v318_v59 = vmul.f32 %v662_v56, %v268_v30  ;;  %v664_v11 = vpop.eup %663 }
 0x4cf   :  { %v315_v12 = vadd.f32 1.0, %v664_v11 }
 0x4d0   :  { %v324_v60 = vmul.f32 %v322_v57, %v319_v58 }
 0x4d1   :  { %665 = vrcp.f32 %v315_v12 }
 0x4d2   :  { %v325_v61 = vadd.f32 %v324_v60, %v318_v59 }
 0x4d4   :  { %327 = vrot.lane.b32.xlu0 %v325_v61, %s696_s19 }
 0x4d8   :  { %378 = vrot.lane.b32.xlu0 %v351_v63, %s696_s19 }
 0x4db   :  { %v851_v14 = vpop.eup %665 }
 0x546   :  { %v328_v16 = vpop.permute.xlu0 %327 }
 0x547   :  { %v854_v17 = vmul.f32 %v851_v14, %v328_v16  ;;  %v353_v18 = vmul.f32 %v727_v1, %v328_v16  ;;  %v366_v38 = vmul.f32 %v775_v39, %v328_v16  ;;  %v879_v16 = vld [vmem:[%s1013_s0 + $0x38] sm:$0xff] }
 0x549   :  { %355 = vrot.lane.b32.xlu1 %v353_v18, %s696_s19  ;;  %v367_v42 = vadd.f32 %v366_v38, %v352_v40 }
 0x54a   :  { %v379_v28 = vpop.permute.xlu0 %378 }
 0x54b   :  { %v368_v45 = vadd.f32 %v785_v43, %v367_v42 }
 0x54d   :  { %v585_v47 = vmul.f32 -1.442695, %v368_v45 }
 0x5bb   :  { %v356_v19 = vpop.permute.xlu1 %355 }
 0x5bc   :  { %v358_v20 = vadd.f32 %v356_v19, %v351_v63  ;;  %v465_v19 = vunpack.c.l.bf16 %v879_v16 }
 0x5be   :  { %v359_v22 = vadd.f32 %v358_v20, %v747_v9  ;;  %v616_v20 = vpack.i.bf16 %v238_v34, %v181_v6  ;;  %v611_v34 = vpack.i.bf16 %v124_v41, %v59_v0 }
 0x5c0   :  { %v584_v24 = vmul.f32 -1.442695, %v359_v22  ;;  %v466_v22 = vunpack.c.h.bf16 %v879_v16 }
 0x5c2   :  { %667 = vpow2.f32 %v584_v24  ;;  %v626_v24 = vpack.i.bf16 %v466_v22, %v409_v52 }
 0x5cc   :  { %v668_v25 = vpop.eup %667 }
 0x5cd   :  { %v363_v26 = vadd.f32 1.0, %v668_v25 }
 0x5cf   :  { %669 = vrcp.f32 %v363_v26 }
 0x5d0   :  { %671 = vpow2.f32 %v585_v47 }
 0x5d9   :  { %v670_v27 = vpop.eup %669 }
 0x5da   :  { %v376_v29 = vsub.f32 1.0, %v670_v27  ;;  %v375_v30 = vmul.f32 %v670_v27, %v325_v61  ;;  %v672_v49 = vpop.eup %671 }
 0x5db   :  { %v372_v51 = vadd.f32 1.0, %v672_v49 }
 0x5dc   :  { %v381_v32 = vmul.f32 %v379_v28, %v376_v29 }
 0x5dd   :  { %673 = vrcp.f32 %v372_v51 }
 0x5de   :  { %v382_v33 = vadd.f32 %v381_v32, %v375_v30  ;;  %v621_v30 = vpack.i.bf16 %v352_v40, %v295_v5 }
 0x5e0   :  { %384 = vrot.lane.b32.xlu1 %v382_v33, %s696_s19 }
 0x5e4   :  { %435 = vrot.lane.b32.xlu1 %v408_v36, %s696_s19 }
 0x5e7   :  { %v867_v53 = vpop.eup %673 }
 0x652   :  { %v385_v54 = vpop.permute.xlu1 %384 }
 0x653   :  { %v870_v55 = vmul.f32 %v867_v53, %v385_v54  ;;  %v410_v56 = vmul.f32 %v727_v1, %v385_v54  ;;  %v423_v57 = vmul.f32 %v775_v39, %v385_v54 }
 0x655   :  { %412 = vrot.lane.b32.xlu0 %v410_v56, %s696_s19  ;;  %v424_v58 = vadd.f32 %v423_v57, %v409_v52 }
 0x656   :  { %v436_v8 = vpop.permute.xlu1 %435 }
 0x657   :  { %v425_v25 = vadd.f32 %v785_v43, %v424_v58 }
 0x659   :  { %v591_v26 = vmul.f32 -1.442695, %v425_v25 }
 0x6c7   :  { %v413_v59 = vpop.permute.xlu0 %412 }
 0x6c8   :  { %v415_v60 = vadd.f32 %v413_v59, %v408_v36 }
 0x6ca   :  { %v416_v61 = vadd.f32 %v415_v60, %v747_v9 }
 0x6cc   :  { %v590_v62 = vmul.f32 -1.442695, %v416_v61 }
 0x6ce   :  { %675 = vpow2.f32 %v590_v62 }
 0x6d8   :  { %v676_v63 = vpop.eup %675 }
 0x6d9   :  { %v420_v4 = vadd.f32 1.0, %v676_v63 }
 0x6db   :  { %677 = vrcp.f32 %v420_v4 }
 0x6dc   :  { %679 = vpow2.f32 %v591_v26 }
 0x6e5   :  { %v678_v7 = vpop.eup %677 }
 0x6e6   :  { %v433_v10 = vsub.f32 1.0, %v678_v7  ;;  %v432_v11 = vmul.f32 %v678_v7, %v382_v33  ;;  %v680_v27 = vpop.eup %679  ;;  %v217_v33 = vsub.f32 1.0, %v809_v13  ;;  %v160_v7 = vsub.f32 1.0, %v788_v48 }
 0x6e7   :  { %v429_v28 = vadd.f32 1.0, %v680_v27 }
 0x6e8   :  { %v438_v12 = vmul.f32 %v436_v8, %v433_v10 }
 0x6e9   :  { %681 = vrcp.f32 %v429_v28 }
 0x6ea   :  { %v881_v18 = vadd.f32 %v438_v12, %v432_v11 }
 0x6ec   :  { %441 = vrot.lane.b32.xlu0 %v881_v18, %s696_s19 }
 0x6f0   :  { %492 = vrot.lane.b32.xlu0 %v465_v19, %s696_s19 }
 0x6f4   :  { %617 = vrot.lane.b32.xlu0 %v616_v20, %s696_s19  ;;  %v331_v20 = vsub.f32 1.0, %v851_v14 }
 0x6f8   :  { %627 = vrot.lane.b32.xlu0 %v626_v24, %s696_s19  ;;  %v388_v24 = vsub.f32 1.0, %v867_v53 }
 0x75e   :  { %v897_v37 = vpop.permute.xlu0 %441 }
 0x75f   :  { %v467_v6 = vmul.f32 %v727_v1, %v897_v37  ;;  %v682_v1 = vpop.eup %681 }
 0x760   :  { %v445_v41 = vsub.f32 1.0, %v682_v1  ;;  %v444_v13 = vmul.f32 %v682_v1, %v897_v37 }
 0x761   :  { %469 = vrot.lane.b32.xlu1 %v467_v6, %s696_s19 }
 0x762   :  { %v905_v29 = vpop.permute.xlu0 %492 }
 0x765   :  { %612 = vrot.lane.b32.xlu1 %v611_v34, %s696_s19 }
 0x766   :  { %v618_v32 = vpop.permute.xlu0 %617 }
 0x767   :  { %v620_v35 = vunpack.i.h.bf16 %v618_v32  ;;  %v619_v36 = vunpack.i.l.bf16 %v618_v32 }
 0x769   :  { %v279_v38 = vmul.f32 %v620_v35, %v274_v2  ;;  %v222_v42 = vmul.f32 %v619_v36, %v217_v33  ;;  %622 = vrot.lane.b32.xlu1 %v621_v30, %s696_s19  ;;  %v480_v35 = vmul.f32 %v775_v39, %v897_v37 }
 0x76a   :  { %v913_v21 = vpop.permute.xlu0 %627 }
 0x76b   :  { %v629_v45 = vunpack.i.l.bf16 %v913_v21  ;;  %v223_v31 = vadd.f32 %v222_v42, %v812_v15  ;;  %v280_v5 = vadd.f32 %v279_v38, %v833_v46  ;;  %v77_v46 = vmul.f32 %v775_v39, %v734_v3 }
 0x76c   :  { %v481_v36 = vadd.f32 %v480_v35, %v466_v22  ;;  %v630_v37 = vunpack.i.h.bf16 %v913_v21 }
 0x76d   :  { %v450_v44 = vmul.f32 %v629_v45, %v445_v41  ;;  %v224_v40 = vpack.c.bf16 %v223_v31, %v223_v31  ;;  %v281_v47 = vpack.c.bf16 %v280_v5, %v280_v5  ;;  %v78_v51 = vadd.f32 %v77_v46, %v59_v0 }
 0x76e   :  { %v482_v1 = vadd.f32 %v785_v43, %v481_v36 }
 0x76f   :  { %568 = vst.msk [vmem:[%s1015_s3 + $0x8] sm:$0xf] %vm111_vm1, %v224_v40  ;;  %v451_v49 = vadd.f32 %v450_v44, %v444_v13  ;;  %574 = vst.msk [vmem:[%s1015_s3 + $0xc] sm:$0xf] %vm111_vm1, %v281_v47  ;;  %v79_v52 = vadd.f32 %v785_v43, %v78_v51 }
 0x771   :  { %v452_v15 = vpack.c.bf16 %v451_v49, %v451_v49  ;;  %v556_v54 = vmul.f32 -1.442695, %v79_v52 }
 0x773   :  { %592 = vst.msk [vmem:[%s1015_s3 + $0x18] sm:$0xf] %vm111_vm1, %v452_v15  ;;  %683 = vpow2.f32 %v556_v54 }
 0x77d   :  { %v684_v56 = vpop.eup %683 }
 0x77e   :  { %v83_v57 = vadd.f32 1.0, %v684_v56 }
 0x780   :  { %685 = vrcp.f32 %v83_v57 }
 0x78a   :  { %v686_v60 = vpop.eup %685 }
 0x78b   :  { %v103_v62 = vsub.f32 1.0, %v686_v60  ;;  %v102_v10 = vmul.f32 %v686_v60, %v758_v23 }
 0x7d3   :  { %v470_v58 = vpop.permute.xlu1 %469 }
 0x7d4   :  { %v472_v59 = vadd.f32 %v470_v58, %v465_v19 }
 0x7d6   :  { %v473_v61 = vadd.f32 %v472_v59, %v747_v9 }
 0x7d7   :  { %v613_v63 = vpop.permute.xlu1 %612 }
 0x7d8   :  { %v596_v4 = vmul.f32 -1.442695, %v473_v61  ;;  %v615_v8 = vunpack.i.h.bf16 %v613_v63  ;;  %v614_v3 = vunpack.i.l.bf16 %v613_v63 }
 0x7da   :  { %687 = vpow2.f32 %v596_v4  ;;  %v165_v11 = vmul.f32 %v615_v8, %v160_v7  ;;  %v108_v12 = vmul.f32 %v614_v3, %v103_v62 }
 0x7db   :  { %v623_v19 = vpop.permute.xlu1 %622 }
 0x7dc   :  { %v625_v25 = vunpack.i.h.bf16 %v623_v19  ;;  %v624_v26 = vunpack.i.l.bf16 %v623_v19  ;;  %v109_v9 = vadd.f32 %v108_v12, %v102_v10  ;;  %v166_v27 = vadd.f32 %v165_v11, %v791_v50 }
 0x7de   :  { %v393_v28 = vmul.f32 %v625_v25, %v388_v24  ;;  %v336_v0 = vmul.f32 %v624_v26, %v331_v20  ;;  %v110_v48 = vpack.c.bf16 %v109_v9, %v109_v9  ;;  %v167_v6 = vpack.c.bf16 %v166_v27, %v166_v27 }
 0x7e0   :  { %116 = vrot.lane.b32.xlu0 %v110_v48, %s697_s17  ;;  %112 = vst.msk [vmem:[%s1015_s3] sm:$0xf] %vm111_vm1, %v110_v48  ;;  %v337_v23 = vadd.f32 %v336_v0, %v854_v17  ;;  %562 = vst.msk [vmem:[%s1015_s3 + $0x4] sm:$0xf] %vm111_vm1, %v167_v6  ;;  %v394_v50 = vadd.f32 %v393_v28, %v870_v55 }
 0x7e2   :  { %v338_v14 = vpack.c.bf16 %v337_v23, %v337_v23  ;;  %v395_v53 = vpack.c.bf16 %v394_v50, %v394_v50 }
 0x7e4   :  { %v688_v34 = vpop.eup %687  ;;  %230 = vrot.lane.b32.xlu0 %v224_v40, %s697_s17  ;;  %580 = vst.msk [vmem:[%s1015_s3 + $0x10] sm:$0xf] %vm111_vm1, %v338_v14  ;;  %586 = vst.msk [vmem:[%s1015_s3 + $0x14] sm:$0xf] %vm111_vm1, %v395_v53 }
 0x7e5   :  { %v477_v17 = vadd.f32 1.0, %v688_v34 }
 0x7e7   :  { %689 = vrcp.f32 %v477_v17 }
 0x7e8   :  { %344 = vrot.lane.b32.xlu0 %v338_v14, %s697_s17 }
 0x7ec   :  { %458 = vrot.lane.b32.xlu0 %v452_v15, %s697_s17 }
 0x7f1   :  { %v690_v55 = vpop.eup %689 }
 0x7f2   :  { %v490_v30 = vsub.f32 1.0, %v690_v55  ;;  %v489_v32 = vmul.f32 %v690_v55, %v881_v18  ;;  %v597_v18 = vmul.f32 -1.442695, %v482_v1 }
 0x7f4   :  { %v495_v33 = vmul.f32 %v905_v29, %v490_v30  ;;  %691 = vpow2.f32 %v597_v18 }
 0x7f6   :  { %v496_v2 = vadd.f32 %v495_v33, %v489_v32 }
 0x7f8   :  { %498 = vrot.lane.b32.xlu1 %v496_v2, %s696_s19 }
 0x7fc   :  { %173 = vrot.lane.b32.xlu1 %v167_v6, %s697_s17 }
 0x7fe   :  { %v692_v38 = vpop.eup %691 }
 0x7ff   :  { %v486_v42 = vadd.f32 1.0, %v692_v38 }
 0x800   :  { %287 = vrot.lane.b32.xlu1 %v281_v47, %s697_s17 }
 0x801   :  { %693 = vrcp.f32 %v486_v42 }
 0x804   :  { %401 = vrot.lane.b32.xlu1 %v395_v53, %s697_s17 }
 0x80b   :  { %v694_v16 = vpop.eup %693 }
 0x80c   :  { %v502_v22 = vsub.f32 1.0, %v694_v16 }
 0x80e   :  { %v507_v31 = vmul.f32 %v630_v37, %v502_v22 }
 0x852   :  { %v117_v29 = vpop.permute.xlu0 %116 }
 0x853   :  { %558 = vst.msk [vmem:[%s1016_s4 + $0x1c] sm:$0xf] %vm111_vm1, %v117_v29 }
 0x856   :  { %v231_v41 = vpop.permute.xlu0 %230 }
 0x857   :  { %570 = vst.msk [vmem:[%s1016_s4 + $0x14] sm:$0xf] %vm111_vm1, %v231_v41 }
 0x85a   :  { %v345_v39 = vpop.permute.xlu0 %344 }
 0x85b   :  { %582 = vst.msk [vmem:[%s1016_s4 + $0xc] sm:$0xf] %vm111_vm1, %v345_v39 }
 0x85e   :  { %v459_v43 = vpop.permute.xlu0 %458 }
 0x85f   :  { %594 = vst.msk [vmem:[%s1016_s4 + $0x4] sm:$0xf] %vm111_vm1, %v459_v43 }
 0x86a   :  { %v499_v45 = vpop.permute.xlu1 %498 }
 0x86b   :  { %v501_v5 = vmul.f32 %v694_v16, %v499_v45  ;;  %520 = vst.msk [vmem:[#allocation2] sm:$0xff] %vm34_vm0, %v499_v45 }
 0x86d   :  { %v508_v13 = vadd.f32 %v507_v31, %v501_v5 }
 0x86e   :  { %v174_v44 = vpop.permute.xlu1 %173 }
 0x86f   :  { %564 = vst.msk [vmem:[%s1016_s4 + $0x18] sm:$0xf] %vm111_vm1, %v174_v44  ;;  %v509_v40 = vpack.c.bf16 %v508_v13, %v508_v13 }
 0x871   :  { %598 = vst.msk [vmem:[%s1015_s3 + $0x1c] sm:$0xf] %vm111_vm1, %v509_v40  ;;  %515 = vrot.lane.b32.xlu1 %v509_v40, %s697_s17 }
 0x872   :  { %v288_v21 = vpop.permute.xlu1 %287 }
 0x873   :  { %576 = vst.msk [vmem:[%s1016_s4 + $0x10] sm:$0xf] %vm111_vm1, %v288_v21 }
 0x876   :  { %v402_v47 = vpop.permute.xlu1 %401 }
 0x877   :  { %588 = vst.msk [vmem:[%s1016_s4 + $0x8] sm:$0xf] %vm111_vm1, %v402_v47 }
 0x8e3   :  { %v516_v49 = vpop.permute.xlu1 %515 }
 0x8e4   :  { %518 = vst.msk [vmem:[%s1016_s4] sm:$0xf] %vm111_vm1, %v516_v49 }

// kernel: conv_bsru_forward.3
= control target key start
LH: loop header
LB: loop body
LE: loop exit
PB: predicated region body
PF: predicated region fallthrough
CT: control target
= control target key end

     0   :  { %vm46_vm0 = vcmask 130048   ;;  %vm124_vm1 = vcmask 261120   ;;  %vm561_vm2 = vcmask 523264   ;;  %s1274_s2 = inlined_call_operand.vmem [shape: bf16[16,32], index: 2, kind: input, shape index: {}]   ;;  %s1275_s1 = inlined_call_operand.vmem [shape: f32[64,16], index: 1, kind: input, shape index: {}]   ;;  %s1276_s0 = inlined_call_operand.vmem [shape: f32[64,16], index: 0, kind: input, shape index: {}]   ;;  %s1277_s7 = inlined_call_operand.vmem [shape: f32[64,32], index: 7, kind: output, shape index: {1}]   ;;  %s1278_s5 = inlined_call_operand.vmem [shape: bf16[64,256], index: 5, kind: input, shape index: {}]   ;;  %s1279_s3 = inlined_call_operand.vmem [shape: f32[1,32], index: 3, kind: input, shape index: {}]   ;;  %s1280_s4 = inlined_call_operand.vmem [shape: f32[1,32], index: 4, kind: input, shape index: {}]   ;;  %s1281_s6 = inlined_call_operand.vmem [shape: bf16[64,256], index: 6, kind: output, shape index: {0}]  }
   0x1   :  { %v818_v0 = vld [vmem:[%s1274_s2] sm:$0xff]   ;;  %v261_v2 = vld [vmem:[%s1275_s1 + $0x8] sm:$0xff]  ;;  %v262_v3 = vld [vmem:[%s1275_s1 + $0x10] sm:$0xff] }
   0x2   :  { %v260_v1 = vld [vmem:[%s1275_s1] sm:$0xff]  ;;  %778 = vmatprep.subr.bf16.mxu1 %v818_v0  ;;  %v263_v5 = vld [vmem:[%s1275_s1 + $0x18] sm:$0xff]  ;;  %v265_v7 = vld [vmem:[%s1275_s1 + $0x28] sm:$0xff]  ;;  %768 = vmatprep.subr.bf16.mxu0 %v818_v0 }
   0x3   :  { %v268_v4 = vpack.c.bf16 %v261_v2, %v260_v1  ;;  %v264_v6 = vld [vmem:[%s1275_s1 + $0x20] sm:$0xff]  ;;  %779 = vmatpush3.bf16.msra.mxu1 %v818_v0  ;;  %v269_v8 = vpack.c.bf16 %v263_v5, %v262_v3  ;;  %769 = vmatpush3.bf16.msra.mxu0 %v818_v0  ;;  %v27_v11 = vld [vmem:[%s1276_s0 + $0x8] sm:$0xff]  ;;  %v28_v12 = vld [vmem:[%s1276_s0 + $0x10] sm:$0xff] }
   0x4   :  { %v270_v9 = vpack.c.bf16 %v265_v7, %v264_v6  ;;  %v26_v10 = vld [vmem:[%s1276_s0] sm:$0xff]  ;;  %v29_v13 = vld [vmem:[%s1276_s0 + $0x18] sm:$0xff]  ;;  %v31_v17 = vld [vmem:[%s1276_s0 + $0x28] sm:$0xff] }
   0x5   :  { %780 = vmatprep.mubr.msk.bf16.mxu1 %vm46_vm0, %v268_v4  ;;  %v34_v14 = vpack.c.bf16 %v27_v11, %v26_v10  ;;  %v35_v15 = vpack.c.bf16 %v29_v13, %v28_v12  ;;  %v30_v16 = vld [vmem:[%s1276_s0 + $0x20] sm:$0xff]  ;;  %v266_v19 = vld [vmem:[%s1275_s1 + $0x30] sm:$0xff]  ;;  %v267_v20 = vld [vmem:[%s1275_s1 + $0x38] sm:$0xff] }
   0x6   :  { %781 = vmatmul.mubr.msk.bf16.vlgmr.msra.gmra.mrb[0].mxu1 %vm46_vm0, %v269_v8  ;;  %v36_v18 = vpack.c.bf16 %v31_v17, %v30_v16  ;;  %v32_v21 = vld [vmem:[%s1276_s0 + $0x30] sm:$0xff]  ;;  %v33_v22 = vld [vmem:[%s1276_s0 + $0x38] sm:$0xff]  ;;  %v271_v23 = vpack.c.bf16 %v267_v20, %v266_v19 }
   0x7   :  { %784 = vmatprep.mubr.msk.bf16.mxu1 %vm46_vm0, %v270_v9  ;;  %770 = vmatprep.mubr.msk.bf16.mxu0 %vm46_vm0, %v34_v14  ;;  %v37_v24 = vpack.c.bf16 %v33_v22, %v32_v21 }
   0x8   :  { %771 = vmatmul.mubr.msk.bf16.vlgmr.msra.gmra.mrb[0].mxu0 %vm46_vm0, %v35_v15 }
   0x9   :  { %774 = vmatprep.mubr.msk.bf16.mxu0 %vm46_vm0, %v36_v18 }
   0xe   :  { %785 = vmatmul.mubr.msk.bf16.gmra.mrb[4].mxu1 %vm46_vm0, %v271_v23 }
  0x10   :  { %775 = vmatmul.mubr.msk.bf16.gmra.mrb[4].mxu0 %vm46_vm0, %v37_v24 }
  0xd9   :  { %v964_v25 = vpop.f32.mrb[0].mxu1 }
  0xda   :  { %v318_v26 = vpop.f32.mrb[1].mxu1  ;;  %v355_v38 = vsel %vm124_vm1, %v964_v25, 0.0 }
  0xdb   :  { %v966_v27 = vpop.f32.mrb[2].mxu1  ;;  %v349_v28 = vsel %vm124_vm1, %v318_v26, 0.0  ;;  %v969_v29 = vpop.f32.mrb[0].mxu0 }
  0xdc   :  { %350 = vadd.xlane.f32.xlu0 %v349_v28  ;;  %v321_v30 = vpop.f32.mrb[3].mxu1  ;;  %705 = vst.msk [vmem:[%s1277_s7 + $0x10] sm:$0xff] %vm124_vm1, %v969_v29  ;;  %v976_v31 = vpop.f32.mrb[1].mxu0  ;;  %v358_v48 = vsel %vm124_vm1, %v966_v27, 0.0  ;;  %v131_v52 = vsel %vm124_vm1, %v969_v29, 0.0 }
  0xdd   :  { %703 = vst.msk [vmem:[%s1277_s7] sm:$0xff] %vm124_vm1, %v976_v31  ;;  %v983_v32 = vpop.f32.mrb[2].mxu0  ;;  %v352_v34 = vsel %vm124_vm1, %v321_v30, 0.0  ;;  %v125_v47 = vsel %vm124_vm1, %v976_v31, 0.0 }
  0xde   :  { %706 = vst.msk [vmem:[%s1277_s7 + $0x18] sm:$0xff] %vm124_vm1, %v983_v32  ;;  %v990_v33 = vpop.f32.mrb[3].mxu0  ;;  %v134_v55 = vsel %vm124_vm1, %v983_v32, 0.0 }
  0xdf   :  { %704 = vst.msk [vmem:[%s1277_s7 + $0x8] sm:$0xff] %vm124_vm1, %v990_v33  ;;  %v128_v51 = vsel %vm124_vm1, %v990_v33, 0.0 }
  0xe0   :  { %353 = vadd.xlane.f32.xlu0 %v352_v34 }
  0xe1   :  { %v998_v35 = vpop.f32.mrb[4].mxu1 }
  0xe2   :  { %v334_v36 = vpop.f32.mrb[5].mxu1  ;;  %v367_v45 = vsel %vm124_vm1, %v998_v35, 0.0 }
  0xe3   :  { %v1000_v37 = vpop.f32.mrb[6].mxu1  ;;  %v361_v39 = vsel %vm124_vm1, %v334_v36, 0.0  ;;  %v1005_v40 = vpop.f32.mrb[4].mxu0 }
  0xe4   :  { %356 = vadd.xlane.f32.xlu0 %v355_v38  ;;  %362 = vadd.xlane.f32.xlu1 %v361_v39  ;;  %v337_v41 = vpop.f32.mrb[7].mxu1  ;;  %709 = vst.msk [vmem:[%s1277_s7 + $0x30] sm:$0xff] %vm124_vm1, %v1005_v40  ;;  %v1012_v42 = vpop.f32.mrb[5].mxu0  ;;  %v370_v50 = vsel %vm124_vm1, %v1000_v37, 0.0  ;;  %v143_v53 = vsel %vm124_vm1, %v1005_v40, 0.0 }
  0xe5   :  { %707 = vst.msk [vmem:[%s1277_s7 + $0x20] sm:$0xff] %vm124_vm1, %v1012_v42  ;;  %v1019_v43 = vpop.f32.mrb[6].mxu0  ;;  %v364_v46 = vsel %vm124_vm1, %v337_v41, 0.0  ;;  %v137_v49 = vsel %vm124_vm1, %v1012_v42, 0.0 }
  0xe6   :  { %710 = vst.msk [vmem:[%s1277_s7 + $0x38] sm:$0xff] %vm124_vm1, %v1019_v43  ;;  %v1026_v44 = vpop.f32.mrb[7].mxu0  ;;  %v146_v56 = vsel %vm124_vm1, %v1019_v43, 0.0 }
  0xe7   :  { %708 = vst.msk [vmem:[%s1277_s7 + $0x28] sm:$0xff] %vm124_vm1, %v1026_v44  ;;  %v140_v54 = vsel %vm124_vm1, %v1026_v44, 0.0 }
  0xe8   :  { %368 = vadd.xlane.f32.xlu0 %v367_v45  ;;  %365 = vadd.xlane.f32.xlu1 %v364_v46 }
  0xec   :  { %359 = vadd.xlane.f32.xlu1 %v358_v48  ;;  %126 = vadd.xlane.f32.xlu0 %v125_v47 }
  0xf0   :  { %371 = vadd.xlane.f32.xlu1 %v370_v50  ;;  %138 = vadd.xlane.f32.xlu0 %v137_v49 }
  0xf4   :  { %129 = vadd.xlane.f32.xlu1 %v128_v51  ;;  %132 = vadd.xlane.f32.xlu0 %v131_v52 }
  0xf8   :  { %144 = vadd.xlane.f32.xlu0 %v143_v53  ;;  %141 = vadd.xlane.f32.xlu1 %v140_v54 }
  0xfc   :  { %135 = vadd.xlane.f32.xlu1 %v134_v55 }
 0x100   :  { %147 = vadd.xlane.f32.xlu1 %v146_v56 }
 0x169   :  { %v351_v57 = vpop.xlane.xlu0 %350 }
 0x16a   :  { %v373_v58 = vmul.f32 0.03125, %v351_v57 }
 0x16c   :  { %v1056_v59 = vsub.f32 %v318_v26, %v373_v58 }
 0x16d   :  { %v354_v60 = vpop.xlane.xlu0 %353 }
 0x16e   :  { %v374_v61 = vmul.f32 0.03125, %v354_v60  ;;  %v389_v62 = vmul.f32 %v1056_v59, %v1056_v59 }
 0x170   :  { %v1060_v63 = vsub.f32 %v321_v30, %v374_v61  ;;  %v397_v0 = vsel %vm124_vm1, %v389_v62, 0.0 }
 0x171   :  { %v357_v1 = vpop.xlane.xlu0 %356  ;;  %v363_v2 = vpop.xlane.xlu1 %362  ;;  %398 = vadd.xlane.f32.xlu0 %v397_v0 }
 0x172   :  { %v375_v3 = vmul.f32 0.03125, %v357_v1  ;;  %v377_v4 = vmul.f32 0.03125, %v363_v2  ;;  %v390_v5 = vmul.f32 %v1060_v63, %v1060_v63 }
 0x174   :  { %v1066_v6 = vsub.f32 %v964_v25, %v375_v3  ;;  %v1068_v7 = vsub.f32 %v334_v36, %v377_v4  ;;  %v400_v8 = vsel %vm124_vm1, %v390_v5, 0.0 }
 0x175   :  { %v369_v9 = vpop.xlane.xlu0 %368  ;;  %v366_v10 = vpop.xlane.xlu1 %365  ;;  %401 = vadd.xlane.f32.xlu1 %v400_v8 }
 0x176   :  { %v379_v11 = vmul.f32 0.03125, %v369_v9  ;;  %v378_v12 = vmul.f32 0.03125, %v366_v10  ;;  %v393_v13 = vmul.f32 %v1068_v7, %v1068_v7  ;;  %v391_v14 = vmul.f32 %v1066_v6, %v1066_v6 }
 0x178   :  { %v1076_v15 = vsub.f32 %v998_v35, %v379_v11  ;;  %v1078_v16 = vsub.f32 %v337_v41, %v378_v12  ;;  %v409_v17 = vsel %vm124_vm1, %v393_v13, 0.0  ;;  %v403_v23 = vsel %vm124_vm1, %v391_v14, 0.0  ;;  %v821_v14 = vld [vmem:[%s1278_s5 + $0x4] ss:$8 sps:$4 sm:$0xff]  }
 0x179   :  { %v360_v18 = vpop.xlane.xlu1 %359  ;;  %v127_v19 = vpop.xlane.xlu0 %126  ;;  %410 = vadd.xlane.f32.xlu0 %v409_v17  ;;  %v824_v17 = vld [vmem:[%s1278_s5 + $0x14] ss:$8 sps:$4 sm:$0xff]   ;;  %574 = vmatprep.subr.bf16.mxu0 %v821_v14 }
 0x17a   :  { %v376_v20 = vmul.f32 0.03125, %v360_v18  ;;  %v150_v21 = vmul.f32 0.03125, %v127_v19  ;;  %v394_v22 = vmul.f32 %v1078_v16, %v1078_v16  ;;  %v395_v28 = vmul.f32 %v1076_v15, %v1076_v15  ;;  %788 = vmatprep.subr.bf16.mxu1 %v821_v14  ;;  %v822_v18 = vld [vmem:[%s1278_s5 + $0x10] ss:$8 sps:$4 sm:$0xff]   ;;  %v827_v19 = vld [vmem:[%s1278_s5 + $0x24] ss:$8 sps:$4 sm:$0xff]  }
 0x17c   :  { %v1085_v24 = vsub.f32 %v966_v27, %v376_v20  ;;  %v1088_v25 = vsub.f32 %v976_v31, %v150_v21  ;;  %v412_v26 = vsel %vm124_vm1, %v394_v22, 0.0  ;;  %v415_v41 = vsel %vm124_vm1, %v395_v28, 0.0  ;;  %v825_v20 = vld [vmem:[%s1278_s5 + $0x20] ss:$8 sps:$4 sm:$0xff]  }
 0x17d   :  { %v372_v30 = vpop.xlane.xlu1 %371  ;;  %404 = vadd.xlane.f32.xlu0 %v403_v23  ;;  %v139_v34 = vpop.xlane.xlu0 %138  ;;  %413 = vadd.xlane.f32.xlu1 %v412_v26 }
 0x17e   :  { %v380_v35 = vmul.f32 0.03125, %v372_v30  ;;  %v154_v36 = vmul.f32 0.03125, %v139_v34  ;;  %v392_v38 = vmul.f32 %v1085_v24, %v1085_v24  ;;  %v166_v27 = vmul.f32 %v1088_v25, %v1088_v25 }
 0x180   :  { %v1098_v31 = vsub.f32 %v1000_v37, %v380_v35  ;;  %v1101_v39 = vsub.f32 %v1012_v42, %v154_v36  ;;  %v406_v45 = vsel %vm124_vm1, %v392_v38, 0.0  ;;  %v174_v51 = vsel %vm124_vm1, %v166_v27, 0.0 }
 0x181   :  { %v130_v46 = vpop.xlane.xlu1 %129  ;;  %416 = vadd.xlane.f32.xlu0 %v415_v41  ;;  %v133_v47 = vpop.xlane.xlu0 %132  ;;  %407 = vadd.xlane.f32.xlu1 %v406_v45 }
 0x182   :  { %v151_v48 = vmul.f32 0.03125, %v130_v46  ;;  %v152_v49 = vmul.f32 0.03125, %v133_v47  ;;  %v396_v50 = vmul.f32 %v1098_v31, %v1098_v31  ;;  %v170_v53 = vmul.f32 %v1101_v39, %v1101_v39 }
 0x184   :  { %v1109_v37 = vsub.f32 %v990_v33, %v151_v48  ;;  %v1112_v42 = vsub.f32 %v969_v29, %v152_v49  ;;  %v418_v52 = vsel %vm124_vm1, %v396_v50, 0.0  ;;  %v186_v33 = vsel %vm124_vm1, %v170_v53, 0.0 }
 0x185   :  { %175 = vadd.xlane.f32.xlu0 %v174_v51  ;;  %v145_v54 = vpop.xlane.xlu0 %144  ;;  %419 = vadd.xlane.f32.xlu1 %v418_v52  ;;  %v142_v55 = vpop.xlane.xlu1 %141  ;;  %v830_v52 = vld [vmem:[%s1278_s5 + $0x34] ss:$8 sps:$4 sm:$0xff]  }
 0x186   :  { %v156_v56 = vmul.f32 0.03125, %v145_v54  ;;  %v167_v57 = vmul.f32 %v1109_v37, %v1109_v37  ;;  %v168_v60 = vmul.f32 %v1112_v42, %v1112_v42  ;;  %v155_v0 = vmul.f32 0.03125, %v142_v55  ;;  %v1173_v55 = vld [vmem:[%s1279_s3] ss:$0 sm:$0xff] }
 0x188   :  { %v1120_v58 = vsub.f32 %v1005_v40, %v156_v56  ;;  %v177_v29 = vsel %vm124_vm1, %v167_v57, 0.0  ;;  %v180_v2 = vsel %vm124_vm1, %v168_v60, 0.0  ;;  %v1135_v8 = vsub.f32 %v1026_v44, %v155_v0  ;;  %v828_v56 = vld [vmem:[%s1278_s5 + $0x30] ss:$8 sps:$4 sm:$0xff]  }
 0x189   :  { %187 = vadd.xlane.f32.xlu0 %v186_v33  ;;  %178 = vadd.xlane.f32.xlu1 %v177_v29  ;;  %v136_v61 = vpop.xlane.xlu1 %135  ;;  %v863_v29 = vmov 0  }
 0x18a   :  { %v153_v62 = vmul.f32 0.03125, %v136_v61  ;;  %v172_v40 = vmul.f32 %v1120_v58, %v1120_v58  ;;  %v171_v13 = vmul.f32 %v1135_v8, %v1135_v8  ;;  %606 = vmatprep.mubr.bf16.mxu0 %v863_v29  ;;  %626 = vmatprep.mubr.bf16.mxu1 %v863_v29 }
 0x18c   :  { %v1127_v1 = vsub.f32 %v983_v32, %v153_v62  ;;  %v192_v32 = vsel %vm124_vm1, %v172_v40, 0.0  ;;  %v189_v44 = vsel %vm124_vm1, %v171_v13, 0.0 }
 0x18d   :  { %181 = vadd.xlane.f32.xlu0 %v180_v2  ;;  %v148_v3 = vpop.xlane.xlu1 %147 }
 0x18e   :  { %v157_v4 = vmul.f32 0.03125, %v148_v3  ;;  %v169_v5 = vmul.f32 %v1127_v1, %v1127_v1  ;;  %v1185_v3 = vld [vmem:[%s1280_s4] ss:$0 sm:$0xff]  ;;  %s864_s4 = smov 32  }
 0x190   :  { %v1138_v9 = vsub.f32 %v1019_v43, %v157_v4  ;;  %v183_v10 = vsel %vm124_vm1, %v169_v5, 0.0  ;;  %v819_v43 = vld [vmem:[%s1278_s5] ss:$8 sps:$4 sm:$0xff]  }
 0x191   :  { %193 = vadd.xlane.f32.xlu0 %v192_v32  ;;  %184 = vadd.xlane.f32.xlu1 %v183_v10 }
 0x192   :  { %v173_v11 = vmul.f32 %v1138_v9, %v1138_v9  ;;  %575 = vmatpush1.bf16.msra.mxu0 %v819_v43  ;;  %792 = vmatpush1.bf16.msra.mxu1 %v819_v43 }
 0x193   :  { %576 = vmatprep.subr.bf16.mxu0 %v824_v17  ;;  %789 = vmatprep.subr.bf16.mxu1 %v824_v17 }
 0x194   :  { %v195_v12 = vsel %vm124_vm1, %v173_v11, 0.0 }
 0x195   :  { %196 = vadd.xlane.f32.xlu1 %v195_v12 }
 0x196   :  { %577 = vmatpush1.bf16.msra.mxu0 %v822_v18  ;;  %793 = vmatpush1.bf16.msra.mxu1 %v822_v18 }
 0x197   :  { %578 = vmatprep.subr.bf16.mxu0 %v827_v19  ;;  %790 = vmatprep.subr.bf16.mxu1 %v827_v19 }
 0x199   :  { %190 = vadd.xlane.f32.xlu1 %v189_v44 }
 0x19a   :  { %579 = vmatpush1.bf16.msra.mxu0 %v825_v20  ;;  %794 = vmatpush1.bf16.msra.mxu1 %v825_v20 }
 0x19b   :  { %580 = vmatprep.subr.bf16.mxu0 %v830_v52  ;;  %791 = vmatprep.subr.bf16.mxu1 %v830_v52 }
 0x19e   :  { %581 = vmatpush1.bf16.msra.mxu0 %v828_v56  ;;  %795 = vmatpush1.bf16.msra.mxu1 %v828_v56 }
 0x1fe   :  { %v399_v21 = vpop.xlane.xlu0 %398 }
 0x1ff   :  { %v421_v22 = vmul.f32 0.03125, %v399_v21 }
 0x201   :  { %v429_v23 = vadd.f32 1e-05, %v421_v22 }
 0x202   :  { %v402_v26 = vpop.xlane.xlu1 %401 }
 0x203   :  { %831 = vrsqrt.f32 %v429_v23  ;;  %v422_v28 = vmul.f32 0.03125, %v402_v26 }
 0x205   :  { %v430_v30 = vadd.f32 1e-05, %v422_v28 }
 0x206   :  { %v411_v34 = vpop.xlane.xlu0 %410 }
 0x207   :  { %833 = vrsqrt.f32 %v430_v30  ;;  %v425_v35 = vmul.f32 0.03125, %v411_v34 }
 0x209   :  { %v433_v36 = vadd.f32 1e-05, %v425_v35 }
 0x20a   :  { %v405_v38 = vpop.xlane.xlu0 %404  ;;  %v414_v27 = vpop.xlane.xlu1 %413 }
 0x20b   :  { %835 = vrsqrt.f32 %v433_v36  ;;  %v423_v41 = vmul.f32 0.03125, %v405_v38  ;;  %v426_v45 = vmul.f32 0.03125, %v414_v27 }
 0x20d   :  { %v832_v46 = vpop.eup %831  ;;  %v431_v47 = vadd.f32 1e-05, %v423_v41  ;;  %v434_v48 = vadd.f32 1e-05, %v426_v45 }
 0x20e   :  { %v417_v49 = vpop.xlane.xlu0 %416  ;;  %v408_v50 = vpop.xlane.xlu1 %407  ;;  %v445_v51 = vmul.f32 %v832_v46, %v1056_v59 }
 0x20f   :  { %837 = vrsqrt.f32 %v431_v47  ;;  %v427_v53 = vmul.f32 0.03125, %v417_v49  ;;  %v424_v54 = vmul.f32 0.03125, %v408_v50 }
 0x210   :  { %839 = vrsqrt.f32 %v434_v48  ;;  %v453_v0 = vmul.f32 %v1173_v55, %v445_v51 }
 0x211   :  { %v834_v59 = vpop.eup %833  ;;  %v435_v57 = vadd.f32 1e-05, %v427_v53  ;;  %v432_v33 = vadd.f32 1e-05, %v424_v54 }
 0x212   :  { %v176_v60 = vpop.xlane.xlu0 %175  ;;  %v420_v61 = vpop.xlane.xlu1 %419  ;;  %v446_v62 = vmul.f32 %v834_v59, %v1060_v63  ;;  %v461_v12 = vadd.f32 %v1185_v3, %v453_v0 }
 0x213   :  { %841 = vrsqrt.f32 %v435_v57  ;;  %v198_v2 = vmul.f32 0.03125, %v176_v60  ;;  %v428_v40 = vmul.f32 0.03125, %v420_v61 }
 0x214   :  { %843 = vrsqrt.f32 %v432_v33  ;;  %v454_v4 = vmul.f32 %v1173_v55, %v446_v62 }
 0x215   :  { %v836_v5 = vpop.eup %835  ;;  %v206_v32 = vadd.f32 1e-05, %v198_v2  ;;  %v436_v10 = vadd.f32 1e-05, %v428_v40 }
 0x216   :  { %v188_v63 = vpop.xlane.xlu0 %187  ;;  %v179_v11 = vpop.xlane.xlu1 %178  ;;  %v462_v13 = vadd.f32 %v1185_v3, %v454_v4  ;;  %v449_v44 = vmul.f32 %v836_v5, %v1068_v7 }
 0x217   :  { %845 = vrsqrt.f32 %v206_v32  ;;  %v202_v43 = vmul.f32 0.03125, %v188_v63  ;;  %v199_v14 = vmul.f32 0.03125, %v179_v11 }
 0x218   :  { %847 = vrsqrt.f32 %v436_v10  ;;  %v798_v17 = vpack.i.bf16 %v462_v13, %v461_v12  ;;  %v457_v23 = vmul.f32 %v1173_v55, %v449_v44 }
 0x219   :  { %v838_v18 = vpop.eup %837  ;;  %v210_v19 = vadd.f32 1e-05, %v202_v43  ;;  %v207_v20 = vadd.f32 1e-05, %v199_v14 }
 0x21a   :  { %v840_v21 = vpop.eup %839  ;;  %v182_v22 = vpop.xlane.xlu0 %181  ;;  %799 = vrot.lane.b32.xlu0 %v798_v17, %s864_s4  ;;  %v447_v7 = vmul.f32 %v838_v18, %v1066_v6  ;;  %v465_v41 = vadd.f32 %v1185_v3, %v457_v23 }
 0x21b   :  { %849 = vrsqrt.f32 %v210_v19  ;;  %v200_v26 = vmul.f32 0.03125, %v182_v22  ;;  %v450_v28 = vmul.f32 %v840_v21, %v1078_v16 }
 0x21c   :  { %851 = vrsqrt.f32 %v207_v20  ;;  %v455_v6 = vmul.f32 %v1173_v55, %v447_v7 }
 0x21d   :  { %v842_v30 = vpop.eup %841  ;;  %v208_v34 = vadd.f32 1e-05, %v200_v26  ;;  %v458_v35 = vmul.f32 %v1173_v55, %v450_v28 }
 0x21e   :  { %v844_v36 = vpop.eup %843  ;;  %v194_v38 = vpop.xlane.xlu0 %193  ;;  %v451_v45 = vmul.f32 %v842_v30, %v1076_v15  ;;  %v463_v33 = vadd.f32 %v1185_v3, %v455_v6 }
 0x21f   :  { %v185_v27 = vpop.xlane.xlu1 %184  ;;  %853 = vrsqrt.f32 %v208_v34  ;;  %v204_v46 = vmul.f32 0.03125, %v194_v38  ;;  %v466_v48 = vadd.f32 %v1185_v3, %v458_v35  ;;  %v448_v16 = vmul.f32 %v844_v36, %v1085_v24 }
 0x220   :  { %v201_v47 = vmul.f32 0.03125, %v185_v27  ;;  %v459_v15 = vmul.f32 %v1173_v55, %v451_v45 }
 0x221   :  { %v846_v49 = vpop.eup %845  ;;  %v212_v50 = vadd.f32 1e-05, %v204_v46  ;;  %v803_v52 = vpack.i.bf16 %v466_v48, %v465_v41  ;;  %v456_v59 = vmul.f32 %v1173_v55, %v448_v16 }
 0x222   :  { %v209_v51 = vadd.f32 1e-05, %v201_v47  ;;  %v848_v53 = vpop.eup %847  ;;  %v222_v54 = vmul.f32 %v846_v49, %v1088_v25  ;;  %v467_v32 = vadd.f32 %v1185_v3, %v459_v15 }
 0x223   :  { %v197_v56 = vpop.xlane.xlu1 %196  ;;  %855 = vrsqrt.f32 %v212_v50  ;;  %804 = vrot.lane.b32.xlu1 %v803_v52, %s864_s4  ;;  %v452_v24 = vmul.f32 %v848_v53, %v1098_v31  ;;  %v464_v60 = vadd.f32 %v1185_v3, %v456_v59 }
 0x224   :  { %v205_v57 = vmul.f32 0.03125, %v197_v56  ;;  %857 = vrsqrt.f32 %v209_v51  ;;  %v237_v61 = vmul.f32 %v1173_v55, %v222_v54 }
 0x225   :  { %v850_v62 = vpop.eup %849  ;;  %v460_v0 = vmul.f32 %v1173_v55, %v452_v24  ;;  %v808_v4 = vpack.i.bf16 %v464_v60, %v463_v33 }
 0x226   :  { %v213_v25 = vadd.f32 1e-05, %v205_v57  ;;  %v852_v2 = vpop.eup %851  ;;  %v226_v40 = vmul.f32 %v850_v62, %v1101_v39  ;;  %v252_v31 = vadd.f32 %v1185_v3, %v237_v61 }
 0x227   :  { %v191_v5 = vpop.xlane.xlu1 %190  ;;  %v223_v10 = vmul.f32 %v852_v2, %v1109_v37  ;;  %v468_v11 = vadd.f32 %v1185_v3, %v460_v0  ;;  %809 = vrot.lane.b32.xlu1 %v808_v4, %s864_s4 }
 0x228   :  { %859 = vrsqrt.f32 %v213_v25  ;;  %v203_v63 = vmul.f32 0.03125, %v191_v5  ;;  %v241_v12 = vmul.f32 %v1173_v55, %v226_v40 }
 0x229   :  { %v854_v13 = vpop.eup %853  ;;  %v813_v43 = vpack.i.bf16 %v468_v11, %v467_v32  ;;  %v238_v39 = vmul.f32 %v1173_v55, %v223_v10 }
 0x22a   :  { %v211_v44 = vadd.f32 1e-05, %v203_v63  ;;  %v224_v14 = vmul.f32 %v854_v13, %v1112_v42  ;;  %v256_v17 = vadd.f32 %v1185_v3, %v241_v12 }
 0x22b   :  { %v253_v37 = vadd.f32 %v1185_v3, %v238_v39  ;;  %814 = vrot.lane.b32.xlu1 %v813_v43, %s864_s4 }
 0x22c   :  { %861 = vrsqrt.f32 %v211_v44  ;;  %v239_v18 = vmul.f32 %v1173_v55, %v224_v14 }
 0x22d   :  { %v856_v19 = vpop.eup %855 }
 0x22e   :  { %v858_v20 = vpop.eup %857  ;;  %v228_v21 = vmul.f32 %v856_v19, %v1120_v58  ;;  %v254_v22 = vadd.f32 %v1185_v3, %v239_v18 }
 0x22f   :  { %v225_v23 = vmul.f32 %v858_v20, %v1127_v1 }
 0x230   :  { %v243_v26 = vmul.f32 %v1173_v55, %v228_v21 }
 0x231   :  { %v240_v28 = vmul.f32 %v1173_v55, %v225_v23 }
 0x232   :  { %v860_v42 = vpop.eup %859  ;;  %v258_v30 = vadd.f32 %v1185_v3, %v243_v26 }
 0x233   :  { %v229_v7 = vmul.f32 %v860_v42, %v1138_v9  ;;  %v255_v34 = vadd.f32 %v1185_v3, %v240_v28 }
 0x235   :  { %v244_v35 = vmul.f32 %v1173_v55, %v229_v7 }
 0x236   :  { %v862_v36 = vpop.eup %861 }
 0x237   :  { %v227_v58 = vmul.f32 %v862_v36, %v1135_v8  ;;  %v259_v38 = vadd.f32 %v1185_v3, %v244_v35 }
 0x239   :  { %v242_v1 = vmul.f32 %v1173_v55, %v227_v58 }
 0x23b   :  { %v257_v27 = vadd.f32 %v1185_v3, %v242_v1 }
 0x28c   :  { %v800_v41 = vpop.permute.xlu0 %799 }
 0x28d   :  { %v802_v45 = vunpack.i.h.bf16 %v800_v41  ;;  %v801_v46 = vunpack.i.l.bf16 %v800_v41 }
 0x28f   :  { %v501_v9 = vsel %vm124_vm1, %v252_v31, %v801_v46  ;;  %v502_v47 = vsel %vm124_vm1, %v253_v37, %v802_v45 }
 0x290   :  { %v509_v48 = vpack.c.bf16 %v502_v47, %v501_v9 }
 0x292   :  { %738 = vmatmul.mubr.msk.bf16.vlgmr.msra.gmra.mrb[8].mxu0 %vm561_vm2, %v509_v48 }
 0x293   :  { %616 = vmatprep.mubr.bf16.mxu0 %v863_v29 }
 0x295   :  { %v805_v8 = vpop.permute.xlu1 %804 }
 0x296   :  { %v807_v16 = vunpack.i.h.bf16 %v805_v8  ;;  %v806_v6 = vunpack.i.l.bf16 %v805_v8 }
 0x298   :  { %v506_v55 = vsel %vm124_vm1, %v257_v27, %v807_v16  ;;  %v505_v3 = vsel %vm124_vm1, %v256_v17, %v806_v6 }
 0x299   :  { %v511_v49 = vpack.c.bf16 %v506_v55, %v505_v3  ;;  %v810_v50 = vpop.permute.xlu1 %809 }
 0x29a   :  { %v812_v51 = vunpack.i.h.bf16 %v810_v50  ;;  %v811_v52 = vunpack.i.l.bf16 %v810_v50 }
 0x29b   :  { %740 = vmatmul.mubr.msk.bf16.vlgmr.msra.gmra.mrb[8].mxu1 %vm561_vm2, %v511_v49 }
 0x29c   :  { %636 = vmatprep.mubr.bf16.mxu1 %v863_v29  ;;  %v504_v53 = vsel %vm124_vm1, %v255_v34, %v812_v51  ;;  %v503_v54 = vsel %vm124_vm1, %v254_v22, %v811_v52 }
 0x29d   :  { %v510_v56 = vpack.c.bf16 %v504_v53, %v503_v54  ;;  %v815_v59 = vpop.permute.xlu1 %814 }
 0x29e   :  { %v817_v15 = vunpack.i.h.bf16 %v815_v59  ;;  %v816_v57 = vunpack.i.l.bf16 %v815_v59 }
 0x29f   :  { %739 = vmatmul.mubr.msk.bf16.gmra.mrb[12].mxu0 %vm561_vm2, %v510_v56 }
 0x2a0   :  { %v508_v24 = vsel %vm124_vm1, %v259_v38, %v817_v15  ;;  %v507_v33 = vsel %vm124_vm1, %v258_v30, %v816_v57 }
 0x2a1   :  { %v512_v60 = vpack.c.bf16 %v508_v24, %v507_v33 }
 0x2a3   :  { %741 = vmatmul.mubr.msk.bf16.gmra.mrb[12].mxu1 %vm561_vm2, %v512_v60 }
 0x365   :  { %v608_v61 = vpop.f32.mrb[8].mxu0 }
 0x366   :  { %v610_v62 = vpop.f32.mrb[9].mxu0 }
 0x367   :  { %v750_v29 = vpack.c.bf16 %v610_v62, %v608_v61  ;;  %v612_v25 = vpop.f32.mrb[10].mxu0 }
 0x368   :  { %v614_v0 = vpop.f32.mrb[11].mxu0 }
 0x369   :  { %695 = vst [vmem:[%s1281_s6] sm:$0xff] %v750_v29  ;;  %v751_v2 = vpack.c.bf16 %v614_v0, %v612_v25 }
 0x36b   :  { %696 = vst [vmem:[%s1281_s6 + $0x8] sm:$0xff] %v751_v2 }
 0x36e   :  { %v628_v40 = vpop.f32.mrb[8].mxu1 }
 0x36f   :  { %v630_v4 = vpop.f32.mrb[9].mxu1 }
 0x370   :  { %v754_v5 = vpack.c.bf16 %v630_v4, %v628_v40  ;;  %v632_v32 = vpop.f32.mrb[10].mxu1 }
 0x371   :  { %v634_v31 = vpop.f32.mrb[11].mxu1 }
 0x372   :  { %699 = vst [vmem:[%s1281_s6 + $0x20] sm:$0xff] %v754_v5  ;;  %v755_v10 = vpack.c.bf16 %v634_v31, %v632_v32  ;;  %v618_v63 = vpop.f32.mrb[12].mxu0 }
 0x373   :  { %v620_v11 = vpop.f32.mrb[13].mxu0 }
 0x374   :  { %700 = vst [vmem:[%s1281_s6 + $0x28] sm:$0xff] %v755_v10  ;;  %v752_v12 = vpack.c.bf16 %v620_v11, %v618_v63  ;;  %v622_v13 = vpop.f32.mrb[14].mxu0 }
 0x375   :  { %v624_v44 = vpop.f32.mrb[15].mxu0 }
 0x376   :  { %697 = vst [vmem:[%s1281_s6 + $0x10] sm:$0xff] %v752_v12  ;;  %v753_v43 = vpack.c.bf16 %v624_v44, %v622_v13  ;;  %v638_v39 = vpop.f32.mrb[12].mxu1 }
 0x377   :  { %v640_v14 = vpop.f32.mrb[13].mxu1 }
 0x378   :  { %698 = vst [vmem:[%s1281_s6 + $0x18] sm:$0xff] %v753_v43  ;;  %v756_v17 = vpack.c.bf16 %v640_v14, %v638_v39  ;;  %v642_v37 = vpop.f32.mrb[14].mxu1 }
 0x379   :  { %v644_v18 = vpop.f32.mrb[15].mxu1 }
 0x37a   :  { %701 = vst [vmem:[%s1281_s6 + $0x30] sm:$0xff] %v756_v17  ;;  %v757_v19 = vpack.c.bf16 %v644_v18, %v642_v37 }
 0x37c   :  { %702 = vst [vmem:[%s1281_s6 + $0x38] sm:$0xff] %v757_v19 }

</bundles_post_ra>
